<compile_context>
chip_gen: v7x
topology: tpu7x:2x2x1
jax: 0.10.0
libtpu: 0.0.40
codegen_flags: <defaults>
</compile_context>

<pallas_src>
import functools

import jax
import jax.numpy as jnp
from jax.experimental import pallas as pl
from jax.experimental.pallas import tpu as pltpu


def _round_up(v, m):
    return ((v + m - 1) // m) * m


def _pad2(a, rows, cols):
    return jnp.pad(a, ((0, rows - a.shape[0]), (0, cols - a.shape[1])))


def _feature_offsets(cardinalities):
    offs, acc = [], 0
    for c in cardinalities:
        offs.append(acc)
        acc += c
    return offs


# ---------------------------------------------------------------------------
# Kernel: on-chip one-hot + fused (embedding·Linear1) + 3 more layers for one
# batch tile. Weights are VMEM-resident (constant index_map); only the int32
# index block and the tiny transposed logit block stream per grid step.
# ---------------------------------------------------------------------------
def _mlp_kernel(idx_ref,
                w1_ref, b1_ref, w2_ref, b2_ref,
                w3_ref, b3_ref, w4_ref, b4_ref,
                out_ref, *, n_features):
    f32 = jnp.float32
    bf16 = jnp.bfloat16
    tb = idx_ref.shape[0]
    cpad = w1_ref.shape[0]

    # Combined one-hot [TB, CPAD] built directly in bf16 (offsets already
    # applied in the wrapper -> per-feature columns are disjoint, so the
    # bf16 0/1 accumulation is exact).
    idx = idx_ref[...]                                            # [TB, F] int32
    lanes = jax.lax.broadcasted_iota(jnp.int32, (tb, cpad), 1)    # [TB, CPAD]
    onehot = (lanes == idx[:, 0:1]).astype(bf16)
    for f in range(1, n_features):                                # F small & static
        onehot = onehot + (lanes == idx[:, f:f + 1]).astype(bf16)

    # Fused embedding + Linear(count, n), then Sigmoid kept on the EUP slot:
    # exp on EUP, approximate reciprocal on EUP.
    h = jnp.dot(onehot, w1_ref[...], preferred_element_type=f32) + b1_ref[...]
    h = pl.reciprocal(1.0 + jnp.exp(-h), approx=True)

    # Linear(n, n) + ReLU  (zero-padded rows of w2 kill the sigmoid(0)=0.5 pad cols)
    h = jnp.dot(h.astype(bf16), w2_ref[...], preferred_element_type=f32) + b2_ref[...]
    h = jnp.maximum(h, 0.0)

    # Linear(n, n) + ReLU
    h = jnp.dot(h.astype(bf16), w3_ref[...], preferred_element_type=f32) + b3_ref[...]
    h = jnp.maximum(h, 0.0)

    # Linear(n, 2) padded to 128 MXU lanes; extra lanes are exactly zero.
    out = jnp.dot(h.astype(bf16), w4_ref[...], preferred_element_type=f32) + b4_ref[...]

    # Lane-dense transposed store: only the 2 real logit rows reach HBM.
    out_ref[...] = jnp.transpose(out)[:2, :].astype(out_ref.dtype)


# ---------------------------------------------------------------------------
# Parameter packing: fuse embedding into Linear1, zero-pad to 128-multiples,
# weights -> bf16 (single cast after the f32 fusion product), biases f32.
# ---------------------------------------------------------------------------
def pack_params(params, cardinalities, n):
    eblk, w1, b1, w2, b2, w3, b3, w4, b4 = params
    count = sum(cardinalities)
    cpad = _round_up(count, 128)
    npad = _round_up(n, 128)
    opad = 128  # MXU-aligned logits; only the first 2 columns are real

    # No nonlinearity between embedding and Linear1 -> fold: w1' = eblk @ w1.
    w1_fused = jnp.dot(eblk, w1)                  # f32 product, then one bf16 cast

    bf16 = jnp.bfloat16
    w1_p = _pad2(w1_fused, cpad, npad).astype(bf16)
    b1_p = _pad2(b1, 1, npad)
    w2_p = _pad2(w2, npad, npad).astype(bf16)     # zero rows >= n kill 0.5 pad cols
    b2_p = _pad2(b2, 1, npad)
    w3_p = _pad2(w3, npad, npad).astype(bf16)
    b3_p = _pad2(b3, 1, npad)
    w4_p = _pad2(w4, npad, opad).astype(bf16)
    b4_p = _pad2(b4, 1, opad)
    return (w1_p, b1_p, w2_p, b2_p, w3_p, b3_p, w4_p, b4_p)


def _choose_tb(B, tb):
    """Batch tile: small batches -> one full tile; large batches -> >=2 tiles,
    each a multiple of 128 (keeps the transposed output block legal and feeds
    both v7x TensorCores via the 'parallel' grid axis)."""
    b8 = _round_up(B, 8)
    if b8 <= 128:
        return b8
    tb128 = max(128, (tb // 128) * 128)
    half = _round_up((B + 1) // 2, 128)
    return min(tb128, half)


# ---------------------------------------------------------------------------
# Wrapper: batch-tiled pallas_call with resident (single-buffered) weights.
# ---------------------------------------------------------------------------
def neural_network_forward(x, packed, cardinalities, *, tb=512):
    """x: [B, F] int32 categorical indices. Returns [B, 2] float32 logits."""
    B, F = x.shape
    offsets = jnp.asarray(_feature_offsets(cardinalities), dtype=jnp.int32)
    flat_idx = x.astype(jnp.int32) + offsets[None, :]             # [B, F]

    w1, b1, w2, b2, w3, b3, w4, b4 = packed
    cpad, npad, opad = w1.shape[0], w1.shape[1], w4.shape[1]

    TB = _choose_tb(B, tb)
    B_pad = _round_up(B, TB)
    if B_pad != B:
        flat_idx = jnp.pad(flat_idx, ((0, B_pad - B), (0, 0)))
    grid = (B_pad // TB,)

    kernel = functools.partial(_mlp_kernel, n_features=F)

    weight_bytes = sum(int(p.size) * p.dtype.itemsize for p in packed)
    tile_bytes = TB * (F * 4 + cpad * 2 + 3 * npad * 4 + opad * 4) + 2 * TB * 4
    vmem_limit = int(min(64 << 20,
                         max(16 << 20, 2 * weight_bytes + 2 * tile_bytes + (4 << 20))))

    cost = pl.CostEstimate(
        flops=2 * B_pad * (cpad * npad + 2 * npad * npad + npad * opad),
        transcendentals=B_pad * npad,
        bytes_accessed=int(flat_idx.size) * 4 + weight_bytes + 2 * B_pad * 4,
    )

    def build(single_buffer_weights):
        if single_buffer_weights:
            def resident(shape):
                return pl.BlockSpec(shape, lambda i: (0, 0),
                                    pipeline_mode=pl.Buffered(1))
        else:
            def resident(shape):
                return pl.BlockSpec(shape, lambda i: (0, 0))

        return pl.pallas_call(
            kernel,
            out_shape=jax.ShapeDtypeStruct((2, B_pad), jnp.float32),
            grid=grid,
            in_specs=[
                pl.BlockSpec((TB, F), lambda i: (i, 0)),   # int32 indices per tile
                resident(w1.shape), resident(b1.shape),
                resident(w2.shape), resident(b2.shape),
                resident(w3.shape), resident(b3.shape),
                resident(w4.shape), resident(b4.shape),
            ],
            out_specs=pl.BlockSpec((2, TB), lambda i: (0, i)),
            compiler_params=pltpu.CompilerParams(
                dimension_semantics=("parallel",),
                vmem_limit_bytes=vmem_limit),
            cost_estimate=cost,
        )

    args = (flat_idx, w1, b1, w2, b2, w3, b3, w4, b4)
    try:
        out_t = build(True)(*args)     # single-buffered invariant weight blocks
    except Exception:
        out_t = build(False)(*args)    # fallback: default buffering

    return out_t[:, :B].T              # [B, 2] real logits


# ---------------------------------------------------------------------------
# Deterministic parameter construction (mirrors nn.Embedding / nn.Linear init).
# ---------------------------------------------------------------------------
def init_params(key, cardinalities, n):
    cards = list(cardinalities)
    count = sum(cards)
    keys = jax.random.split(key, len(cards) + 8)

    # Embedding tables ~ N(0, 1) (PyTorch default), placed block-diagonally so
    # onehot @ eblk == concat of per-feature embedding lookups.
    eblk = jnp.zeros((count, count), dtype=jnp.float32)
    off = 0
    for i, c in enumerate(cards):
        tbl = jax.random.normal(keys[i], (c, c), dtype=jnp.float32)
        eblk = eblk.at[off:off + c, off:off + c].set(tbl)
        off += c

    def linear(kw, kb, fan_in, fan_out):
        bound = 1.0 / jnp.sqrt(jnp.asarray(fan_in, jnp.float32))
        w = jax.random.uniform(kw, (fan_in, fan_out), jnp.float32, -bound, bound)
        b = jax.random.uniform(kb, (1, fan_out), jnp.float32, -bound, bound)
        return w, b

    k = len(cards)
    w1, b1 = linear(keys[k + 0], keys[k + 1], count, n)
    w2, b2 = linear(keys[k + 2], keys[k + 3], n, n)
    w3, b3 = linear(keys[k + 4], keys[k + 5], n, n)
    w4, b4 = linear(keys[k + 6], keys[k + 7], n, 2)
    return (eblk, w1, b1, w2, b2, w3, b3, w4, b4)


# Pure-JAX reference using the SAME packed (fused, padded, bf16) params and the
# same bf16-input / f32-accumulate matmul semantics as the kernel.
def reference_forward(x, packed, cardinalities):
    f32, bf16 = jnp.float32, jnp.bfloat16
    offsets = jnp.asarray(_feature_offsets(cardinalities), dtype=jnp.int32)
    flat_idx = x.astype(jnp.int32) + offsets[None, :]
    w1, b1, w2, b2, w3, b3, w4, b4 = packed
    cpad = w1.shape[0]
    onehot = jnp.sum(jax.nn.one_hot(flat_idx, cpad, dtype=f32), axis=1).astype(bf16)
    h = jax.nn.sigmoid(jnp.dot(onehot, w1, preferred_element_type=f32) + b1)
    h = jnp.maximum(jnp.dot(h.astype(bf16), w2, preferred_element_type=f32) + b2, 0.0)
    h = jnp.maximum(jnp.dot(h.astype(bf16), w3, preferred_element_type=f32) + b3, 0.0)
    out = jnp.dot(h.astype(bf16), w4, preferred_element_type=f32) + b4
    return out[:, :2]


def _make_inputs(key, cardinalities, B):
    cols = []
    for c in cardinalities:
        key, ki = jax.random.split(key)
        cols.append(jax.random.randint(ki, (B,), 0, c, dtype=jnp.int32))
    return jnp.stack(cols, axis=1)      # [B, F] int32


if __name__ == "__main__":
    # Synthetic categorical schema (stands in for the mushroom CSV columns).
    # TODO(synk): per-feature cardinalities come from pandas nunique() in the
    # original; hard-coded here since the script may not read files.
    cardinalities = (3, 4, 5, 2, 6, 4)   # per-feature n_categories == embed_dim
    n_hidden = 32                        # small stand-in for n=1000
    B = 8

    key = jax.random.PRNGKey(0)
    kp, kx = jax.random.split(key)
    params = init_params(kp, cardinalities, n_hidden)
    packed = pack_params(params, cardinalities, n_hidden)

    # Small single-tile batch.
    x = _make_inputs(kx, cardinalities, B)
    out = neural_network_forward(x, packed, cardinalities)
    out = jax.block_until_ready(out)
    ref = reference_forward(x, packed, cardinalities)
    assert out.shape == (B, 2)
    assert jnp.allclose(out, ref, atol=2e-2, rtol=2e-2), "mismatch vs reference (B=8)"

    # Multi-tile batch (exercises grid >= 2 / megacore sharding path).
    B2 = 200
    x2 = _make_inputs(jax.random.PRNGKey(1), cardinalities, B2)
    out2 = jax.block_until_ready(neural_network_forward(x2, packed, cardinalities))
    ref2 = reference_forward(x2, packed, cardinalities)
    assert out2.shape == (B2, 2)
    assert jnp.allclose(out2, ref2, atol=2e-2, rtol=2e-2), "mismatch vs reference (B=200)"

    print("KERNEL_OK")
</pallas_src>

<mosaic_0001>
module attributes {stable_mosaic.version = 11 : i64} {
  func.func @_mlp_kernel(%arg0: i32, %arg1: memref<8x6xi32, #tpu.memory_space<vmem>>, %arg2: memref<128x128xbf16, #tpu.memory_space<vmem>>, %arg3: memref<1x128xf32, #tpu.memory_space<vmem>>, %arg4: memref<128x128xbf16, #tpu.memory_space<vmem>>, %arg5: memref<1x128xf32, #tpu.memory_space<vmem>>, %arg6: memref<128x128xbf16, #tpu.memory_space<vmem>>, %arg7: memref<1x128xf32, #tpu.memory_space<vmem>>, %arg8: memref<128x128xbf16, #tpu.memory_space<vmem>>, %arg9: memref<1x128xf32, #tpu.memory_space<vmem>>, %arg10: memref<2x8xf32, #tpu.memory_space<vmem>>) attributes {dimension_semantics = [#tpu.dimension_semantics<parallel>], iteration_bounds = array<i64: 1>, scalar_prefetch = 0 : i64, scratch_operands = 0 : i64, tpu.core_type = #tpu.core_type<tc>, window_params = [{transform_indices = @transform_0, window_bounds = array<i64: 8, 6>}, {pipeline_mode = #tpu.pipeline_mode<synchronous>, transform_indices = @transform_1, window_bounds = array<i64: 128, 128>}, {pipeline_mode = #tpu.pipeline_mode<synchronous>, transform_indices = @transform_2, window_bounds = array<i64: 1, 128>}, {pipeline_mode = #tpu.pipeline_mode<synchronous>, transform_indices = @transform_3, window_bounds = array<i64: 128, 128>}, {pipeline_mode = #tpu.pipeline_mode<synchronous>, transform_indices = @transform_4, window_bounds = array<i64: 1, 128>}, {pipeline_mode = #tpu.pipeline_mode<synchronous>, transform_indices = @transform_5, window_bounds = array<i64: 128, 128>}, {pipeline_mode = #tpu.pipeline_mode<synchronous>, transform_indices = @transform_6, window_bounds = array<i64: 1, 128>}, {pipeline_mode = #tpu.pipeline_mode<synchronous>, transform_indices = @transform_7, window_bounds = array<i64: 128, 128>}, {pipeline_mode = #tpu.pipeline_mode<synchronous>, transform_indices = @transform_8, window_bounds = array<i64: 1, 128>}, {transform_indices = @transform_9, window_bounds = array<i64: 2, 8>}]} {
    %c0 = arith.constant 0 : index
    %c0_0 = arith.constant 0 : index
    %0 = vector.load %arg1[%c0, %c0_0] : memref<8x6xi32, #tpu.memory_space<vmem>>, vector<8x6xi32>
    %1 = tpu.iota {dimensions = array<i32: 1>} : vector<8x128xi32>
    %2 = vector.extract_strided_slice %0 {offsets = [0, 0], sizes = [8, 1], strides = [1, 1]} : vector<8x6xi32> to vector<8x1xi32>
    %3 = vector.broadcast %2 : vector<8x1xi32> to vector<8x128xi32>
    %4 = arith.cmpi eq, %1, %3 : vector<8x128xi32>
    %5 = arith.extui %4 : vector<8x128xi1> to vector<8x128xi32>
    %6 = arith.sitofp %5 : vector<8x128xi32> to vector<8x128xf32>
    %7 = arith.truncf %6 : vector<8x128xf32> to vector<8x128xbf16>
    %8 = vector.extract_strided_slice %0 {offsets = [0, 1], sizes = [8, 1], strides = [1, 1]} : vector<8x6xi32> to vector<8x1xi32>
    %9 = vector.broadcast %8 : vector<8x1xi32> to vector<8x128xi32>
    %10 = arith.cmpi eq, %1, %9 : vector<8x128xi32>
    %11 = arith.extui %10 : vector<8x128xi1> to vector<8x128xi32>
    %12 = arith.sitofp %11 : vector<8x128xi32> to vector<8x128xf32>
    %13 = arith.truncf %12 : vector<8x128xf32> to vector<8x128xbf16>
    %14 = arith.addf %7, %13 : vector<8x128xbf16>
    %15 = vector.extract_strided_slice %0 {offsets = [0, 2], sizes = [8, 1], strides = [1, 1]} : vector<8x6xi32> to vector<8x1xi32>
    %16 = vector.broadcast %15 : vector<8x1xi32> to vector<8x128xi32>
    %17 = arith.cmpi eq, %1, %16 : vector<8x128xi32>
    %18 = arith.extui %17 : vector<8x128xi1> to vector<8x128xi32>
    %19 = arith.sitofp %18 : vector<8x128xi32> to vector<8x128xf32>
    %20 = arith.truncf %19 : vector<8x128xf32> to vector<8x128xbf16>
    %21 = arith.addf %14, %20 : vector<8x128xbf16>
    %22 = vector.extract_strided_slice %0 {offsets = [0, 3], sizes = [8, 1], strides = [1, 1]} : vector<8x6xi32> to vector<8x1xi32>
    %23 = vector.broadcast %22 : vector<8x1xi32> to vector<8x128xi32>
    %24 = arith.cmpi eq, %1, %23 : vector<8x128xi32>
    %25 = arith.extui %24 : vector<8x128xi1> to vector<8x128xi32>
    %26 = arith.sitofp %25 : vector<8x128xi32> to vector<8x128xf32>
    %27 = arith.truncf %26 : vector<8x128xf32> to vector<8x128xbf16>
    %28 = arith.addf %21, %27 : vector<8x128xbf16>
    %29 = vector.extract_strided_slice %0 {offsets = [0, 4], sizes = [8, 1], strides = [1, 1]} : vector<8x6xi32> to vector<8x1xi32>
    %30 = vector.broadcast %29 : vector<8x1xi32> to vector<8x128xi32>
    %31 = arith.cmpi eq, %1, %30 : vector<8x128xi32>
    %32 = arith.extui %31 : vector<8x128xi1> to vector<8x128xi32>
    %33 = arith.sitofp %32 : vector<8x128xi32> to vector<8x128xf32>
    %34 = arith.truncf %33 : vector<8x128xf32> to vector<8x128xbf16>
    %35 = arith.addf %28, %34 : vector<8x128xbf16>
    %36 = vector.extract_strided_slice %0 {offsets = [0, 5], sizes = [8, 1], strides = [1, 1]} : vector<8x6xi32> to vector<8x1xi32>
    %37 = vector.broadcast %36 : vector<8x1xi32> to vector<8x128xi32>
    %38 = arith.cmpi eq, %1, %37 : vector<8x128xi32>
    %39 = arith.extui %38 : vector<8x128xi1> to vector<8x128xi32>
    %40 = arith.sitofp %39 : vector<8x128xi32> to vector<8x128xf32>
    %41 = arith.truncf %40 : vector<8x128xf32> to vector<8x128xbf16>
    %42 = arith.addf %35, %41 : vector<8x128xbf16>
    %c0_1 = arith.constant 0 : index
    %c0_2 = arith.constant 0 : index
    %43 = vector.load %arg2[%c0_1, %c0_2] : memref<128x128xbf16, #tpu.memory_space<vmem>>, vector<128x128xbf16>
    %cst = arith.constant dense<0.000000e+00> : vector<8x128xf32>
    %44 = tpu.matmul %42, %43, %cst {dimension_numbers = #tpu.dot_dimension_numbers<[1], [0], [0], [1], [0, 0, 1, 1], [], []>} : vector<8x128xbf16>, vector<128x128xbf16>, vector<8x128xf32> -> vector<8x128xf32>
    %c0_3 = arith.constant 0 : index
    %c0_4 = arith.constant 0 : index
    %45 = vector.load %arg3[%c0_3, %c0_4] : memref<1x128xf32, #tpu.memory_space<vmem>>, vector<1x128xf32>
    %46 = vector.broadcast %45 : vector<1x128xf32> to vector<8x128xf32>
    %47 = arith.addf %44, %46 : vector<8x128xf32>
    %cst_5 = arith.constant 0.000000e+00 : f32
    %48 = vector.broadcast %cst_5 : f32 to vector<8x128xf32>
    %49 = arith.subf %48, %47 : vector<8x128xf32>
    %50 = math.exp %49 : vector<8x128xf32>
    %cst_6 = arith.constant 1.000000e+00 : f32
    %51 = vector.broadcast %cst_6 : f32 to vector<8x128xf32>
    %52 = arith.addf %51, %50 : vector<8x128xf32>
    %53 = tpu.reciprocal %52 {approx = true} : vector<8x128xf32> -> vector<8x128xf32>
    %54 = arith.truncf %53 : vector<8x128xf32> to vector<8x128xbf16>
    %c0_7 = arith.constant 0 : index
    %c0_8 = arith.constant 0 : index
    %55 = vector.load %arg4[%c0_7, %c0_8] : memref<128x128xbf16, #tpu.memory_space<vmem>>, vector<128x128xbf16>
    %cst_9 = arith.constant dense<0.000000e+00> : vector<8x128xf32>
    %56 = tpu.matmul %54, %55, %cst_9 {dimension_numbers = #tpu.dot_dimension_numbers<[1], [0], [0], [1], [0, 0, 1, 1], [], []>} : vector<8x128xbf16>, vector<128x128xbf16>, vector<8x128xf32> -> vector<8x128xf32>
    %c0_10 = arith.constant 0 : index
    %c0_11 = arith.constant 0 : index
    %57 = vector.load %arg5[%c0_10, %c0_11] : memref<1x128xf32, #tpu.memory_space<vmem>>, vector<1x128xf32>
    %58 = vector.broadcast %57 : vector<1x128xf32> to vector<8x128xf32>
    %59 = arith.addf %56, %58 : vector<8x128xf32>
    %cst_12 = arith.constant 0.000000e+00 : f32
    %60 = vector.broadcast %cst_12 : f32 to vector<8x128xf32>
    %61 = arith.maximumf %59, %60 : vector<8x128xf32>
    %62 = arith.truncf %61 : vector<8x128xf32> to vector<8x128xbf16>
    %c0_13 = arith.constant 0 : index
    %c0_14 = arith.constant 0 : index
    %63 = vector.load %arg6[%c0_13, %c0_14] : memref<128x128xbf16, #tpu.memory_space<vmem>>, vector<128x128xbf16>
    %cst_15 = arith.constant dense<0.000000e+00> : vector<8x128xf32>
    %64 = tpu.matmul %62, %63, %cst_15 {dimension_numbers = #tpu.dot_dimension_numbers<[1], [0], [0], [1], [0, 0, 1, 1], [], []>} : vector<8x128xbf16>, vector<128x128xbf16>, vector<8x128xf32> -> vector<8x128xf32>
    %c0_16 = arith.constant 0 : index
    %c0_17 = arith.constant 0 : index
    %65 = vector.load %arg7[%c0_16, %c0_17] : memref<1x128xf32, #tpu.memory_space<vmem>>, vector<1x128xf32>
    %66 = vector.broadcast %65 : vector<1x128xf32> to vector<8x128xf32>
    %67 = arith.addf %64, %66 : vector<8x128xf32>
    %cst_18 = arith.constant 0.000000e+00 : f32
    %68 = vector.broadcast %cst_18 : f32 to vector<8x128xf32>
    %69 = arith.maximumf %67, %68 : vector<8x128xf32>
    %70 = arith.truncf %69 : vector<8x128xf32> to vector<8x128xbf16>
    %c0_19 = arith.constant 0 : index
    %c0_20 = arith.constant 0 : index
    %71 = vector.load %arg8[%c0_19, %c0_20] : memref<128x128xbf16, #tpu.memory_space<vmem>>, vector<128x128xbf16>
    %cst_21 = arith.constant dense<0.000000e+00> : vector<8x128xf32>
    %72 = tpu.matmul %70, %71, %cst_21 {dimension_numbers = #tpu.dot_dimension_numbers<[1], [0], [0], [1], [0, 0, 1, 1], [], []>} : vector<8x128xbf16>, vector<128x128xbf16>, vector<8x128xf32> -> vector<8x128xf32>
    %c0_22 = arith.constant 0 : index
    %c0_23 = arith.constant 0 : index
    %73 = vector.load %arg9[%c0_22, %c0_23] : memref<1x128xf32, #tpu.memory_space<vmem>>, vector<1x128xf32>
    %74 = vector.broadcast %73 : vector<1x128xf32> to vector<8x128xf32>
    %75 = arith.addf %72, %74 : vector<8x128xf32>
    %76 = tpu.transpose %75, [1, 0] : vector<8x128xf32> -> vector<128x8xf32>
    %77 = vector.extract_strided_slice %76 {offsets = [0, 0], sizes = [2, 8], strides = [1, 1]} : vector<128x8xf32> to vector<2x8xf32>
    %c0_24 = arith.constant 0 : index
    %c0_25 = arith.constant 0 : index
    %78 = vector.load %arg10[%c0_24, %c0_25] : memref<2x8xf32, #tpu.memory_space<vmem>>, vector<2x8xf32>
    tpu.vector_store %arg10[%c0_24, %c0_25], %77 {strides = array<i32>} : memref<2x8xf32, #tpu.memory_space<vmem>>, vector<2x8xf32>,
    return
  }
  func.func @transform_0(%arg0: i32) -> (i32, i32) {
    %c0_i32 = arith.constant 0 : i32
    %c0_i32_0 = arith.constant 0 : i32
    return %arg0, %c0_i32 : i32, i32
  }
  func.func @transform_1(%arg0: i32) -> (i32, i32) {
    %c0_i32 = arith.constant 0 : i32
    %c0_i32_0 = arith.constant 0 : i32
    %c0_i32_1 = arith.constant 0 : i32
    return %c0_i32, %c0_i32_0 : i32, i32
  }
  func.func @transform_2(%arg0: i32) -> (i32, i32) {
    %c0_i32 = arith.constant 0 : i32
    %c0_i32_0 = arith.constant 0 : i32
    %c0_i32_1 = arith.constant 0 : i32
    return %c0_i32, %c0_i32_0 : i32, i32
  }
  func.func @transform_3(%arg0: i32) -> (i32, i32) {
    %c0_i32 = arith.constant 0 : i32
    %c0_i32_0 = arith.constant 0 : i32
    %c0_i32_1 = arith.constant 0 : i32
    return %c0_i32, %c0_i32_0 : i32, i32
  }
  func.func @transform_4(%arg0: i32) -> (i32, i32) {
    %c0_i32 = arith.constant 0 : i32
    %c0_i32_0 = arith.constant 0 : i32
    %c0_i32_1 = arith.constant 0 : i32
    return %c0_i32, %c0_i32_0 : i32, i32
  }
  func.func @transform_5(%arg0: i32) -> (i32, i32) {
    %c0_i32 = arith.constant 0 : i32
    %c0_i32_0 = arith.constant 0 : i32
    %c0_i32_1 = arith.constant 0 : i32
    return %c0_i32, %c0_i32_0 : i32, i32
  }
  func.func @transform_6(%arg0: i32) -> (i32, i32) {
    %c0_i32 = arith.constant 0 : i32
    %c0_i32_0 = arith.constant 0 : i32
    %c0_i32_1 = arith.constant 0 : i32
    return %c0_i32, %c0_i32_0 : i32, i32
  }
  func.func @transform_7(%arg0: i32) -> (i32, i32) {
    %c0_i32 = arith.constant 0 : i32
    %c0_i32_0 = arith.constant 0 : i32
    %c0_i32_1 = arith.constant 0 : i32
    return %c0_i32, %c0_i32_0 : i32, i32
  }
  func.func @transform_8(%arg0: i32) -> (i32, i32) {
    %c0_i32 = arith.constant 0 : i32
    %c0_i32_0 = arith.constant 0 : i32
    %c0_i32_1 = arith.constant 0 : i32
    return %c0_i32, %c0_i32_0 : i32, i32
  }
  func.func @transform_9(%arg0: i32) -> (i32, i32) {
    %c0_i32 = arith.constant 0 : i32
    %c0_i32_0 = arith.constant 0 : i32
    return %c0_i32, %arg0 : i32, i32
  }
}

module attributes {stable_mosaic.version = 11 : i64} {
  func.func @_mlp_kernel(%arg0: i32, %arg1: memref<8x6xi32, #tpu.memory_space<vmem>>, %arg2: memref<128x128xbf16, #tpu.memory_space<vmem>>, %arg3: memref<1x128xf32, #tpu.memory_space<vmem>>, %arg4: memref<128x128xbf16, #tpu.memory_space<vmem>>, %arg5: memref<1x128xf32, #tpu.memory_space<vmem>>, %arg6: memref<128x128xbf16, #tpu.memory_space<vmem>>, %arg7: memref<1x128xf32, #tpu.memory_space<vmem>>, %arg8: memref<128x128xbf16, #tpu.memory_space<vmem>>, %arg9: memref<1x128xf32, #tpu.memory_space<vmem>>, %arg10: memref<2x8xf32, #tpu.memory_space<vmem>>) attributes {dimension_semantics = [#tpu.dimension_semantics<parallel>], iteration_bounds = array<i64: 1>, scalar_prefetch = 0 : i64, scratch_operands = 0 : i64, tpu.core_type = #tpu.core_type<tc>, window_params = [{transform_indices = @transform_0, window_bounds = array<i64: 8, 6>}, {pipeline_mode = #tpu.pipeline_mode<synchronous>, transform_indices = @transform_1, window_bounds = array<i64: 128, 128>}, {pipeline_mode = #tpu.pipeline_mode<synchronous>, transform_indices = @transform_2, window_bounds = array<i64: 1, 128>}, {pipeline_mode = #tpu.pipeline_mode<synchronous>, transform_indices = @transform_3, window_bounds = array<i64: 128, 128>}, {pipeline_mode = #tpu.pipeline_mode<synchronous>, transform_indices = @transform_4, window_bounds = array<i64: 1, 128>}, {pipeline_mode = #tpu.pipeline_mode<synchronous>, transform_indices = @transform_5, window_bounds = array<i64: 128, 128>}, {pipeline_mode = #tpu.pipeline_mode<synchronous>, transform_indices = @transform_6, window_bounds = array<i64: 1, 128>}, {pipeline_mode = #tpu.pipeline_mode<synchronous>, transform_indices = @transform_7, window_bounds = array<i64: 128, 128>}, {pipeline_mode = #tpu.pipeline_mode<synchronous>, transform_indices = @transform_8, window_bounds = array<i64: 1, 128>}, {transform_indices = @transform_9, window_bounds = array<i64: 2, 8>}]} {
    %c0 = arith.constant 0 : index
    %c0_0 = arith.constant 0 : index
    %0 = vector.load %arg1[%c0, %c0_0] : memref<8x6xi32, #tpu.memory_space<vmem>>, vector<8x6xi32>
    %1 = tpu.iota {dimensions = array<i32: 1>} : vector<8x128xi32>
    %2 = vector.extract_strided_slice %0 {offsets = [0, 0], sizes = [8, 1], strides = [1, 1]} : vector<8x6xi32> to vector<8x1xi32>
    %3 = vector.broadcast %2 : vector<8x1xi32> to vector<8x128xi32>
    %4 = arith.cmpi eq, %1, %3 : vector<8x128xi32>
    %5 = arith.extui %4 : vector<8x128xi1> to vector<8x128xi32>
    %6 = arith.sitofp %5 : vector<8x128xi32> to vector<8x128xf32>
    %7 = arith.truncf %6 : vector<8x128xf32> to vector<8x128xbf16>
    %8 = vector.extract_strided_slice %0 {offsets = [0, 1], sizes = [8, 1], strides = [1, 1]} : vector<8x6xi32> to vector<8x1xi32>
    %9 = vector.broadcast %8 : vector<8x1xi32> to vector<8x128xi32>
    %10 = arith.cmpi eq, %1, %9 : vector<8x128xi32>
    %11 = arith.extui %10 : vector<8x128xi1> to vector<8x128xi32>
    %12 = arith.sitofp %11 : vector<8x128xi32> to vector<8x128xf32>
    %13 = arith.truncf %12 : vector<8x128xf32> to vector<8x128xbf16>
    %14 = arith.addf %7, %13 : vector<8x128xbf16>
    %15 = vector.extract_strided_slice %0 {offsets = [0, 2], sizes = [8, 1], strides = [1, 1]} : vector<8x6xi32> to vector<8x1xi32>
    %16 = vector.broadcast %15 : vector<8x1xi32> to vector<8x128xi32>
    %17 = arith.cmpi eq, %1, %16 : vector<8x128xi32>
    %18 = arith.extui %17 : vector<8x128xi1> to vector<8x128xi32>
    %19 = arith.sitofp %18 : vector<8x128xi32> to vector<8x128xf32>
    %20 = arith.truncf %19 : vector<8x128xf32> to vector<8x128xbf16>
    %21 = arith.addf %14, %20 : vector<8x128xbf16>
    %22 = vector.extract_strided_slice %0 {offsets = [0, 3], sizes = [8, 1], strides = [1, 1]} : vector<8x6xi32> to vector<8x1xi32>
    %23 = vector.broadcast %22 : vector<8x1xi32> to vector<8x128xi32>
    %24 = arith.cmpi eq, %1, %23 : vector<8x128xi32>
    %25 = arith.extui %24 : vector<8x128xi1> to vector<8x128xi32>
    %26 = arith.sitofp %25 : vector<8x128xi32> to vector<8x128xf32>
    %27 = arith.truncf %26 : vector<8x128xf32> to vector<8x128xbf16>
    %28 = arith.addf %21, %27 : vector<8x128xbf16>
    %29 = vector.extract_strided_slice %0 {offsets = [0, 4], sizes = [8, 1], strides = [1, 1]} : vector<8x6xi32> to vector<8x1xi32>
    %30 = vector.broadcast %29 : vector<8x1xi32> to vector<8x128xi32>
    %31 = arith.cmpi eq, %1, %30 : vector<8x128xi32>
    %32 = arith.extui %31 : vector<8x128xi1> to vector<8x128xi32>
    %33 = arith.sitofp %32 : vector<8x128xi32> to vector<8x128xf32>
    %34 = arith.truncf %33 : vector<8x128xf32> to vector<8x128xbf16>
    %35 = arith.addf %28, %34 : vector<8x128xbf16>
    %36 = vector.extract_strided_slice %0 {offsets = [0, 5], sizes = [8, 1], strides = [1, 1]} : vector<8x6xi32> to vector<8x1xi32>
    %37 = vector.broadcast %36 : vector<8x1xi32> to vector<8x128xi32>
    %38 = arith.cmpi eq, %1, %37 : vector<8x128xi32>
    %39 = arith.extui %38 : vector<8x128xi1> to vector<8x128xi32>
    %40 = arith.sitofp %39 : vector<8x128xi32> to vector<8x128xf32>
    %41 = arith.truncf %40 : vector<8x128xf32> to vector<8x128xbf16>
    %42 = arith.addf %35, %41 : vector<8x128xbf16>
    %c0_1 = arith.constant 0 : index
    %c0_2 = arith.constant 0 : index
    %43 = vector.load %arg2[%c0_1, %c0_2] : memref<128x128xbf16, #tpu.memory_space<vmem>>, vector<128x128xbf16>
    %cst = arith.constant dense<0.000000e+00> : vector<8x128xf32>
    %44 = tpu.matmul %42, %43, %cst {dimension_numbers = #tpu.dot_dimension_numbers<[1], [0], [0], [1], [0, 0, 1, 1], [], []>} : vector<8x128xbf16>, vector<128x128xbf16>, vector<8x128xf32> -> vector<8x128xf32>
    %c0_3 = arith.constant 0 : index
    %c0_4 = arith.constant 0 : index
    %45 = vector.load %arg3[%c0_3, %c0_4] : memref<1x128xf32, #tpu.memory_space<vmem>>, vector<1x128xf32>
    %46 = vector.broadcast %45 : vector<1x128xf32> to vector<8x128xf32>
    %47 = arith.addf %44, %46 : vector<8x128xf32>
    %cst_5 = arith.constant 0.000000e+00 : f32
    %48 = vector.broadcast %cst_5 : f32 to vector<8x128xf32>
    %49 = arith.subf %48, %47 : vector<8x128xf32>
    %50 = math.exp %49 : vector<8x128xf32>
    %cst_6 = arith.constant 1.000000e+00 : f32
    %51 = vector.broadcast %cst_6 : f32 to vector<8x128xf32>
    %52 = arith.addf %51, %50 : vector<8x128xf32>
    %53 = tpu.reciprocal %52 {approx = true} : vector<8x128xf32> -> vector<8x128xf32>
    %54 = arith.truncf %53 : vector<8x128xf32> to vector<8x128xbf16>
    %c0_7 = arith.constant 0 : index
    %c0_8 = arith.constant 0 : index
    %55 = vector.load %arg4[%c0_7, %c0_8] : memref<128x128xbf16, #tpu.memory_space<vmem>>, vector<128x128xbf16>
    %cst_9 = arith.constant dense<0.000000e+00> : vector<8x128xf32>
    %56 = tpu.matmul %54, %55, %cst_9 {dimension_numbers = #tpu.dot_dimension_numbers<[1], [0], [0], [1], [0, 0, 1, 1], [], []>} : vector<8x128xbf16>, vector<128x128xbf16>, vector<8x128xf32> -> vector<8x128xf32>
    %c0_10 = arith.constant 0 : index
    %c0_11 = arith.constant 0 : index
    %57 = vector.load %arg5[%c0_10, %c0_11] : memref<1x128xf32, #tpu.memory_space<vmem>>, vector<1x128xf32>
    %58 = vector.broadcast %57 : vector<1x128xf32> to vector<8x128xf32>
    %59 = arith.addf %56, %58 : vector<8x128xf32>
    %cst_12 = arith.constant 0.000000e+00 : f32
    %60 = vector.broadcast %cst_12 : f32 to vector<8x128xf32>
    %61 = arith.maximumf %59, %60 : vector<8x128xf32>
    %62 = arith.truncf %61 : vector<8x128xf32> to vector<8x128xbf16>
    %c0_13 = arith.constant 0 : index
    %c0_14 = arith.constant 0 : index
    %63 = vector.load %arg6[%c0_13, %c0_14] : memref<128x128xbf16, #tpu.memory_space<vmem>>, vector<128x128xbf16>
    %cst_15 = arith.constant dense<0.000000e+00> : vector<8x128xf32>
    %64 = tpu.matmul %62, %63, %cst_15 {dimension_numbers = #tpu.dot_dimension_numbers<[1], [0], [0], [1], [0, 0, 1, 1], [], []>} : vector<8x128xbf16>, vector<128x128xbf16>, vector<8x128xf32> -> vector<8x128xf32>
    %c0_16 = arith.constant 0 : index
    %c0_17 = arith.constant 0 : index
    %65 = vector.load %arg7[%c0_16, %c0_17] : memref<1x128xf32, #tpu.memory_space<vmem>>, vector<1x128xf32>
    %66 = vector.broadcast %65 : vector<1x128xf32> to vector<8x128xf32>
    %67 = arith.addf %64, %66 : vector<8x128xf32>
    %cst_18 = arith.constant 0.000000e+00 : f32
    %68 = vector.broadcast %cst_18 : f32 to vector<8x128xf32>
    %69 = arith.maximumf %67, %68 : vector<8x128xf32>
    %70 = arith.truncf %69 : vector<8x128xf32> to vector<8x128xbf16>
    %c0_19 = arith.constant 0 : index
    %c0_20 = arith.constant 0 : index
    %71 = vector.load %arg8[%c0_19, %c0_20] : memref<128x128xbf16, #tpu.memory_space<vmem>>, vector<128x128xbf16>
    %cst_21 = arith.constant dense<0.000000e+00> : vector<8x128xf32>
    %72 = tpu.matmul %70, %71, %cst_21 {dimension_numbers = #tpu.dot_dimension_numbers<[1], [0], [0], [1], [0, 0, 1, 1], [], []>} : vector<8x128xbf16>, vector<128x128xbf16>, vector<8x128xf32> -> vector<8x128xf32>
    %c0_22 = arith.constant 0 : index
    %c0_23 = arith.constant 0 : index
    %73 = vector.load %arg9[%c0_22, %c0_23] : memref<1x128xf32, #tpu.memory_space<vmem>>, vector<1x128xf32>
    %74 = vector.broadcast %73 : vector<1x128xf32> to vector<8x128xf32>
    %75 = arith.addf %72, %74 : vector<8x128xf32>
    %76 = tpu.transpose %75, [1, 0] : vector<8x128xf32> -> vector<128x8xf32>
    %77 = vector.extract_strided_slice %76 {offsets = [0, 0], sizes = [2, 8], strides = [1, 1]} : vector<128x8xf32> to vector<2x8xf32>
    %c0_24 = arith.constant 0 : index
    %c0_25 = arith.constant 0 : index
    %78 = vector.load %arg10[%c0_24, %c0_25] : memref<2x8xf32, #tpu.memory_space<vmem>>, vector<2x8xf32>
    tpu.vector_store %arg10[%c0_24, %c0_25], %77 {strides = array<i32>} : memref<2x8xf32, #tpu.memory_space<vmem>>, vector<2x8xf32>,
    return
  }
  func.func @transform_0(%arg0: i32) -> (i32, i32) {
    %c0_i32 = arith.constant 0 : i32
    %c0_i32_0 = arith.constant 0 : i32
    return %arg0, %c0_i32 : i32, i32
  }
  func.func @transform_1(%arg0: i32) -> (i32, i32) {
    %c0_i32 = arith.constant 0 : i32
    %c0_i32_0 = arith.constant 0 : i32
    %c0_i32_1 = arith.constant 0 : i32
    return %c0_i32, %c0_i32_0 : i32, i32
  }
  func.func @transform_2(%arg0: i32) -> (i32, i32) {
    %c0_i32 = arith.constant 0 : i32
    %c0_i32_0 = arith.constant 0 : i32
    %c0_i32_1 = arith.constant 0 : i32
    return %c0_i32, %c0_i32_0 : i32, i32
  }
  func.func @transform_3(%arg0: i32) -> (i32, i32) {
    %c0_i32 = arith.constant 0 : i32
    %c0_i32_0 = arith.constant 0 : i32
    %c0_i32_1 = arith.constant 0 : i32
    return %c0_i32, %c0_i32_0 : i32, i32
  }
  func.func @transform_4(%arg0: i32) -> (i32, i32) {
    %c0_i32 = arith.constant 0 : i32
    %c0_i32_0 = arith.constant 0 : i32
    %c0_i32_1 = arith.constant 0 : i32
    return %c0_i32, %c0_i32_0 : i32, i32
  }
  func.func @transform_5(%arg0: i32) -> (i32, i32) {
    %c0_i32 = arith.constant 0 : i32
    %c0_i32_0 = arith.constant 0 : i32
    %c0_i32_1 = arith.constant 0 : i32
    return %c0_i32, %c0_i32_0 : i32, i32
  }
  func.func @transform_6(%arg0: i32) -> (i32, i32) {
    %c0_i32 = arith.constant 0 : i32
    %c0_i32_0 = arith.constant 0 : i32
    %c0_i32_1 = arith.constant 0 : i32
    return %c0_i32, %c0_i32_0 : i32, i32
  }
  func.func @transform_7(%arg0: i32) -> (i32, i32) {
    %c0_i32 = arith.constant 0 : i32
    %c0_i32_0 = arith.constant 0 : i32
    %c0_i32_1 = arith.constant 0 : i32
    return %c0_i32, %c0_i32_0 : i32, i32
  }
  func.func @transform_8(%arg0: i32) -> (i32, i32) {
    %c0_i32 = arith.constant 0 : i32
    %c0_i32_0 = arith.constant 0 : i32
    %c0_i32_1 = arith.constant 0 : i32
    return %c0_i32, %c0_i32_0 : i32, i32
  }
  func.func @transform_9(%arg0: i32) -> (i32, i32) {
    %c0_i32 = arith.constant 0 : i32
    %c0_i32_0 = arith.constant 0 : i32
    return %c0_i32, %arg0 : i32, i32
  }
}

</mosaic_0001>

<bundles_post_ra>
// kernel: tpu_custom_call.1
= control target key start
LH: loop header
LB: loop body
LE: loop exit
PB: predicated region body
PF: predicated region fallthrough
CT: control target
= control target key end

     0   :  { %14 = vsyncpa [#allocation3], 0  ;;  %s1219_s0 = inlined_call_operand.hbm [shape: s32[8,6], index: 0, kind: input, shape index: {}]   ;;  %s1220_s1 = inlined_call_operand.hbm [shape: bf16[128,128], index: 1, kind: input, shape index: {}]   ;;  %s1221_s2 = inlined_call_operand.vmem [shape: f32[1,128], index: 2, kind: input, shape index: {}]   ;;  %s1222_s3 = inlined_call_operand.hbm [shape: bf16[128,128], index: 3, kind: input, shape index: {}]   ;;  %s1223_s4 = inlined_call_operand.vmem [shape: f32[1,128], index: 4, kind: input, shape index: {}]   ;;  %s1224_s5 = inlined_call_operand.hbm [shape: bf16[128,128], index: 5, kind: input, shape index: {}]   ;;  %s1225_s6 = inlined_call_operand.vmem [shape: f32[1,128], index: 6, kind: input, shape index: {}]   ;;  %s1226_s7 = inlined_call_operand.hbm [shape: bf16[128,128], index: 7, kind: input, shape index: {}]   ;;  %s1227_s8 = inlined_call_operand.vmem [shape: f32[1,128], index: 8, kind: input, shape index: {}]   ;;  %s1228_s9 = inlined_call_operand.hbm [shape: f32[2,8], index: 9, kind: output, shape index: {}]  }
   0x1   :  { %15 = vsyncpa [#allocation6], 0 }
   0x2   :  { %16 = vsyncpa [#allocation9], 0 }
   0x3   :  { %17 = vsyncpa [#allocation4], 0  ;;  %s1011_s30 = smov [#allocation5]   ;;  %s871_s13 = scalar_lea.hbm %s1220_s1, 1024 }
   0x4   :  { %s33_s10 = sshll.u32 %s1011_s30, 4  ;;  %p872_p0 = scmp.ne.s32.totalorder %s1220_s1, %s871_s13  ;;  %s34_s10 = int_to_ptr.vmem [resolvable:$true] %s33_s10 }
   0x5   :  { %p875_p1 = scmp.lt.u32.totalorder %s871_s13, %s1220_s1 }
   0x7   :  { %p877_p2 = pnand %p875_p1, %p872_p0 }
   0x9   :  { %880 = shalt.err (!%p877_p2)
}
   0xa   :  { %s881_s18 = scalar_lea.vmem %s34_s10, 1024  ;;  %p886_p4 = scmp.lt.s32.totalorder %s34_s10, %s34_s10 }
   0xb   :  { %p882_p3 = scmp.ne.s32.totalorder %s34_s10, %s881_s18  ;;  %p887_p5 = scmp.lt.s32.totalorder %s881_s18, %s881_s18 }
   0xd   :  { %p888_p6 = por %p887_p5, %p886_p4 }
   0xf   :  { %p889_p7 = pnand %p888_p6, %p882_p3 }
  0x11   :  { %892 = shalt.err (!%p889_p7)
}
  0x12   :  { %s1012_s19 = smov 64   ;;  %s1013_s20 = smov 4  }
  0x13   :  { %39 = dma.hbm_to_vmem [thread:$0]  %s1220_s1, 1024, %s34_s10, [#allocation6], %s1012_s19, %s1012_s19, %s1013_s20  }
  0x14   :  { %s1014_s23 = smov [#allocation8]   ;;  %s1015_s25 = smov [#allocation2]  }
  0x15   :  { %s61_s24 = sshll.u32 %s1014_s23, 4  ;;  %s24_s26 = sshll.u32 %s1015_s25, 4  ;;  %s62_s24 = int_to_ptr.vmem [resolvable:$true] %s61_s24  ;;  %s25_s26 = int_to_ptr.vmem [resolvable:$true] %s24_s26 }
  0x16   :  { %s893_s29 = scalar_lea.hbm %s1224_s5, 1024 }
  0x17   :  { %p894_p8 = scmp.ne.s32.totalorder %s1224_s5, %s893_s29  ;;  %p897_p9 = scmp.lt.u32.totalorder %s893_s29, %s1224_s5 }
  0x19   :  { %p899_p10 = pnand %p897_p9, %p894_p8 }
  0x1b   :  { %902 = shalt.err (!%p899_p10)
}
  0x1c   :  { %s903_s1 = scalar_lea.vmem %s62_s24, 1024  ;;  %p908_p12 = scmp.lt.s32.totalorder %s62_s24, %s62_s24 }
  0x1d   :  { %p904_p11 = scmp.ne.s32.totalorder %s62_s24, %s903_s1  ;;  %p909_p13 = scmp.lt.s32.totalorder %s903_s1, %s903_s1 }
  0x1f   :  { %p910_p0 = por %p909_p13, %p908_p12 }
  0x21   :  { %p911_p1 = pnand %p910_p0, %p904_p11 }
  0x23   :  { %914 = shalt.err (!%p911_p1)
}
  0x24   :  { %67 = dma.hbm_to_vmem [thread:$0]  %s1224_s5, 1024, %s62_s24, [#allocation9], %s1012_s19, %s1012_s19, %s1013_s20  }
  0x25   :  { %s915_s17 = scalar_lea.hbm %s1219_s0, 128 }
  0x26   :  { %p916_p2 = scmp.ne.s32.totalorder %s1219_s0, %s915_s17  ;;  %p919_p3 = scmp.lt.u32.totalorder %s915_s17, %s1219_s0 }
  0x28   :  { %p921_p4 = pnand %p919_p3, %p916_p2 }
  0x2a   :  { %924 = shalt.err (!%p921_p4)
}
  0x2b   :  { %s925_s25 = scalar_lea.vmem %s25_s26, 128  ;;  %p930_p6 = scmp.lt.s32.totalorder %s25_s26, %s25_s26 }
  0x2c   :  { %p926_p5 = scmp.ne.s32.totalorder %s25_s26, %s925_s25  ;;  %p931_p7 = scmp.lt.s32.totalorder %s925_s25, %s925_s25 }
  0x2e   :  { %p932_p8 = por %p931_p7, %p930_p6 }
  0x30   :  { %p933_p9 = pnand %p932_p8, %p926_p5 }
  0x32   :  { %936 = shalt.err (!%p933_p9)
}
  0x33   :  { %27 = dma.hbm_to_vmem [thread:$0]  %s1219_s0, 128, %s25_s26, [#allocation3]  }
  0x34   :  { %s1016_s27 = smov [#allocation7]   ;;  %s1017_s29 = smov [#allocation10]  }
  0x35   :  { %s47_s28 = sshll.u32 %s1016_s27, 4  ;;  %s75_s30 = sshll.u32 %s1017_s29, 4  ;;  %s48_s28 = int_to_ptr.vmem [resolvable:$true] %s47_s28  ;;  %s76_s30 = int_to_ptr.vmem [resolvable:$true] %s75_s30 }
  0x36   :  { %s937_s13 = scalar_lea.hbm %s1222_s3, 1024 }
  0x37   :  { %p938_p10 = scmp.ne.s32.totalorder %s1222_s3, %s937_s13  ;;  %p941_p11 = scmp.lt.u32.totalorder %s937_s13, %s1222_s3 }
  0x39   :  { %p943_p12 = pnand %p941_p11, %p938_p10 }
  0x3b   :  { %946 = shalt.err (!%p943_p12)
}
  0x3c   :  { %s947_s0 = scalar_lea.vmem %s48_s28, 1024  ;;  %p952_p0 = scmp.lt.s32.totalorder %s48_s28, %s48_s28 }
  0x3d   :  { %p948_p13 = scmp.ne.s32.totalorder %s48_s28, %s947_s0  ;;  %p953_p1 = scmp.lt.s32.totalorder %s947_s0, %s947_s0 }
  0x3f   :  { %p954_p2 = por %p953_p1, %p952_p0 }
  0x41   :  { %p955_p3 = pnand %p954_p2, %p948_p13 }
  0x43   :  { %958 = shalt.err (!%p955_p3)
}
  0x44   :  { %53 = dma.hbm_to_vmem [thread:$0]  %s1222_s3, 1024, %s48_s28, [#allocation6], %s1012_s19, %s1012_s19, %s1013_s20  }
  0x45   :  { %s959_s21 = scalar_lea.hbm %s1226_s7, 1024 }
  0x46   :  { %p960_p4 = scmp.ne.s32.totalorder %s1226_s7, %s959_s21  ;;  %p963_p5 = scmp.lt.u32.totalorder %s959_s21, %s1226_s7 }
  0x48   :  { %p965_p6 = pnand %p963_p5, %p960_p4 }
  0x4a   :  { %968 = shalt.err (!%p965_p6)
}
  0x4b   :  { %s969_s24 = scalar_lea.vmem %s76_s30, 1024  ;;  %p974_p8 = scmp.lt.s32.totalorder %s76_s30, %s76_s30 }
  0x4c   :  { %p970_p7 = scmp.ne.s32.totalorder %s76_s30, %s969_s24  ;;  %p975_p9 = scmp.lt.s32.totalorder %s969_s24, %s969_s24 }
  0x4e   :  { %p976_p10 = por %p975_p9, %p974_p8 }
  0x50   :  { %p977_p11 = pnand %p976_p10, %p970_p7 }
  0x52   :  { %980 = shalt.err (!%p977_p11)
}
  0x53   :  { %81 = dma.hbm_to_vmem [thread:$0]  %s1226_s7, 1024, %s76_s30, [#allocation9], %s1012_s19, %s1012_s19, %s1013_s20  }
  0x54   :  { %1003 = dma.done.wait [#allocation3], 128  }
  0x55   :  { %1004 = vsyncadd [#allocation3], 4294967168 }
  0x56   :  { %1005 = dma.done.wait [#allocation6], 2048  }
  0x57   :  { %1006 = vsyncadd [#allocation6], 4294965248 }
  0x58   :  { %1007 = dma.done.wait [#allocation9], 2048  }
  0x59   :  { %1008 = vsyncadd [#allocation9], 4294965248  ;;  %v1018_v0 = vmov 0   ;;  %v1019_v1 = vmov 2   ;;  %v1020_v2 = vmov 0.0   ;;  %v100_v3 = vld [vmem:[#allocation2] sm:$0xff]  ;;  %v101_v16 = vlaneseq }
  0x5a   :  { %829 = vset.pattern.permute.xlu0 %v1018_v0  ;;  %831 = vset.pattern.permute.xlu1 %v1019_v1  ;;  %v835_v4 = vld [vmem:[#allocation5] sm:$0xff]   ;;  %v836_v5 = vld [vmem:[#allocation5 + $0x8] sm:$0xff]   ;;  %v1021_v6 = vmov 1   ;;  %v1022_v7 = vmov 3   ;;  %v837_v8 = vld [vmem:[#allocation5 + $0x10] sm:$0xff]   ;;  %v1023_v9 = vmov 4  }
  0x5b   :  { %733 = vmatprep.subr.bf16.mxu0 %v1020_v2  ;;  %753 = vmatprep.subr.bf16.mxu1 %v1020_v2  ;;  %v1024_v10 = vmov 5   ;;  %v838_v11 = vld [vmem:[#allocation5 + $0x18] sm:$0xff]   ;;  %v839_v12 = vld [vmem:[#allocation5 + $0x20] sm:$0xff]   ;;  %vm1025_vm0 = vmmov 0   ;;  %v840_v13 = vld [vmem:[#allocation5 + $0x28] sm:$0xff]   ;;  %v102_v17 = vand.u32 127, %v101_v16 }
  0x5c   :  { %104 = vperm.xlu0 %829, %v100_v3   ;;  %119 = vperm.xlu1 %831, %v100_v3   ;;  %v841_v14 = vld [vmem:[#allocation5 + $0x30] sm:$0xff]   ;;  %v842_v15 = vld [vmem:[#allocation5 + $0x38] sm:$0xff]   ;;  %v843_v41 = vld [vmem:[#allocation7] sm:$0xff]   ;;  %s1026_s11 = smov [#allocation11]   ;;  %vm636_vm7 = vcmask 58368  }
  0x5d   :  { %734 = vmatpush3.bf16.msra.mxu0 %v835_v4  ;;  %749 = vmatprep.mubr.msk.bf16.mxu0 %vm1025_vm0, %v1020_v2  ;;  %v844_v42 = vld [vmem:[#allocation7 + $0x8] sm:$0xff]   ;;  %v845_v43 = vld [vmem:[#allocation7 + $0x10] sm:$0xff]   ;;  %v846_v44 = vld [vmem:[#allocation7 + $0x18] sm:$0xff]  }
  0x5e   :  { %735 = vmatprep.subr.bf16.mxu0 %v1020_v2  ;;  %769 = vmatprep.mubr.msk.bf16.mxu1 %vm1025_vm0, %v1020_v2  ;;  %v847_v45 = vld [vmem:[#allocation7 + $0x20] sm:$0xff]   ;;  %v848_v46 = vld [vmem:[#allocation7 + $0x28] sm:$0xff]   ;;  %v849_v47 = vld [vmem:[#allocation7 + $0x30] sm:$0xff]  }
  0x5f   :  { %754 = vmatpush3.bf16.msra.mxu1 %v843_v41  ;;  %v850_v48 = vld [vmem:[#allocation7 + $0x38] sm:$0xff]   ;;  %v851_v49 = vld [vmem:[#allocation8] sm:$0xff]   ;;  %v852_v50 = vld [vmem:[#allocation8 + $0x8] sm:$0xff]  }
  0x60   :  { %830 = vset.pattern.permute.xlu0 %v1021_v6  ;;  %832 = vset.pattern.permute.xlu1 %v1022_v7  ;;  %v853_v51 = vld [vmem:[#allocation8 + $0x10] sm:$0xff]   ;;  %v854_v52 = vld [vmem:[#allocation8 + $0x18] sm:$0xff]   ;;  %v855_v53 = vld [vmem:[#allocation8 + $0x20] sm:$0xff]  }
  0x61   :  { %111 = vperm.xlu0 %830, %v100_v3   ;;  %127 = vperm.xlu1 %832, %v100_v3   ;;  %v856_v54 = vld [vmem:[#allocation8 + $0x28] sm:$0xff]   ;;  %v661_v55 = vld [vmem:[%s1221_s2] ss:$0 sm:$0xff]  ;;  %v857_v4 = vld [vmem:[#allocation8 + $0x30] sm:$0xff]  }
  0x62   :  { %736 = vmatpush3.bf16.msra.mxu0 %v836_v5  ;;  %755 = vmatprep.subr.bf16.mxu1 %v1020_v2  ;;  %v858_v5 = vld [vmem:[#allocation8 + $0x38] sm:$0xff]   ;;  %v859_v6 = vld [vmem:[#allocation10] sm:$0xff]   ;;  %v860_v7 = vld [vmem:[#allocation10 + $0x8] sm:$0xff]  }
  0x63   :  { %737 = vmatprep.subr.bf16.mxu0 %v1020_v2  ;;  %756 = vmatpush3.bf16.msra.mxu1 %v844_v42 }
  0x64   :  { %757 = vmatprep.subr.bf16.mxu1 %v1020_v2 }
  0x65   :  { %833 = vset.pattern.permute.xlu1 %v1023_v9  ;;  %834 = vset.pattern.permute.xlu0 %v1024_v10  ;;  %v862_v9 = vld [vmem:[#allocation10 + $0x18] sm:$0xff]   ;;  %v863_v10 = vld [vmem:[#allocation10 + $0x20] sm:$0xff]  }
  0x66   :  { %135 = vperm.xlu1 %833, %v100_v3   ;;  %143 = vperm.xlu0 %834, %v100_v3  }
  0x67   :  { %738 = vmatpush3.bf16.msra.mxu0 %v837_v8  ;;  %758 = vmatpush3.bf16.msra.mxu1 %v845_v43  ;;  %v861_v8 = vld [vmem:[#allocation10 + $0x10] sm:$0xff]  }
  0x68   :  { %739 = vmatprep.subr.bf16.mxu0 %v1020_v2  ;;  %759 = vmatprep.subr.bf16.mxu1 %v1020_v2 }
  0x6b   :  { %740 = vmatpush3.bf16.msra.mxu0 %v838_v11  ;;  %760 = vmatpush3.bf16.msra.mxu1 %v846_v44  ;;  %v864_v11 = vld [vmem:[#allocation10 + $0x28] sm:$0xff]  }
  0x6c   :  { %741 = vmatprep.subr.bf16.mxu0 %v1020_v2  ;;  %761 = vmatprep.subr.bf16.mxu1 %v1020_v2 }
  0x6f   :  { %742 = vmatpush3.bf16.msra.mxu0 %v839_v12  ;;  %762 = vmatpush3.bf16.msra.mxu1 %v847_v45  ;;  %v670_v12 = vld [vmem:[%s1223_s4] ss:$0 sm:$0xff] }
  0x70   :  { %743 = vmatprep.subr.bf16.mxu0 %v1020_v2  ;;  %763 = vmatprep.subr.bf16.mxu1 %v1020_v2 }
  0x73   :  { %744 = vmatpush3.bf16.msra.mxu0 %v840_v13  ;;  %764 = vmatpush3.bf16.msra.mxu1 %v848_v46 }
  0x74   :  { %745 = vmatprep.subr.bf16.mxu0 %v1020_v2  ;;  %765 = vmatprep.subr.bf16.mxu1 %v1020_v2 }
  0x77   :  { %746 = vmatpush3.bf16.msra.mxu0 %v841_v14  ;;  %766 = vmatpush3.bf16.msra.mxu1 %v849_v47 }
  0x78   :  { %747 = vmatprep.subr.bf16.mxu0 %v1020_v2  ;;  %767 = vmatprep.subr.bf16.mxu1 %v1020_v2 }
  0x7b   :  { %748 = vmatpush3.bf16.msra.mxu0 %v842_v15  ;;  %768 = vmatpush3.bf16.msra.mxu1 %v850_v48 }
  0x7c   :  { %773 = vmatprep.subr.bf16.mxu0 %v1020_v2  ;;  %793 = vmatprep.subr.bf16.mxu1 %v1020_v2 }
  0xdb   :  { %v105_v18 = vpop.permute.xlu0 %104  ;;  %v120_v19 = vpop.permute.xlu1 %119 }
  0xdc   :  { %vm106_vm1 = vcmp.eq.s32.totalorder %v102_v17, %v105_v18  ;;  %vm121_vm2 = vcmp.eq.s32.totalorder %v102_v17, %v120_v19 }
  0xdd   :  { %v655_v20 = vsel %vm106_vm1, 1.0, %v1020_v2  ;;  %v657_v23 = vsel %vm121_vm2, 1.0, %v1020_v2 }
  0xde   :  { %v109_v25 = vpack.c.bf16 %v655_v20, %v655_v20  ;;  %v124_v28 = vpack.c.bf16 %v657_v23, %v657_v23  ;;  %v865_v20 = vld [vmem:[#allocation10 + $0x30] sm:$0xff]  }
  0xe0   :  { %v112_v21 = vpop.permute.xlu0 %111  ;;  %v128_v22 = vpop.permute.xlu1 %127 }
  0xe1   :  { %vm113_vm3 = vcmp.eq.s32.totalorder %v102_v17, %v112_v21  ;;  %vm129_vm4 = vcmp.eq.s32.totalorder %v102_v17, %v128_v22  ;;  %v866_v21 = vld [vmem:[#allocation10 + $0x38] sm:$0xff]  }
  0xe2   :  { %v656_v24 = vsel %vm113_vm3, 1.0, %v1020_v2  ;;  %v658_v27 = vsel %vm129_vm4, 1.0, %v1020_v2  ;;  %v679_v22 = vld [vmem:[%s1225_s6] ss:$0 sm:$0xff]  ;;  %s644_s6 = sshll.u32 %s1026_s11, 4  ;;  %s645_s6 = int_to_ptr.vmem [resolvable:$true] %s644_s6 }
  0xe3   :  { %v116_v26 = vpack.c.bf16 %v656_v24, %v656_v24  ;;  %v132_v33 = vpack.c.bf16 %v658_v27, %v658_v27  ;;  %s981_s12 = scalar_lea.vmem %s645_s6, 32  ;;  %p986_p13 = scmp.lt.s32.totalorder %s645_s6, %s645_s6 }
  0xe4   :  { %p982_p12 = scmp.ne.s32.totalorder %s645_s6, %s981_s12  ;;  %p987_p0 = scmp.lt.s32.totalorder %s981_s12, %s981_s12 }
  0xe5   :  { %v117_v29 = vadd.bf16 %v116_v26, %v109_v25  ;;  %v136_v30 = vpop.permute.xlu1 %135  ;;  %v144_v31 = vpop.permute.xlu0 %143 }
  0xe6   :  { %vm137_vm5 = vcmp.eq.s32.totalorder %v102_v17, %v136_v30  ;;  %vm145_vm6 = vcmp.eq.s32.totalorder %v102_v17, %v144_v31  ;;  %v688_v30 = vld [vmem:[%s1227_s8] ss:$0 sm:$0xff]  ;;  %p988_p1 = por %p987_p0, %p986_p13 }
  0xe7   :  { %v125_v32 = vadd.bf16 %v124_v28, %v117_v29  ;;  %v659_v34 = vsel %vm137_vm5, 1.0, %v1020_v2  ;;  %v660_v35 = vsel %vm145_vm6, 1.0, %v1020_v2 }
  0xe8   :  { %v140_v36 = vpack.c.bf16 %v659_v34, %v659_v34  ;;  %v148_v38 = vpack.c.bf16 %v660_v35, %v660_v35  ;;  %p989_p2 = pnand %p988_p1, %p982_p12 }
  0xe9   :  { %v133_v37 = vadd.bf16 %v132_v33, %v125_v32 }
  0xeb   :  { %v141_v39 = vadd.bf16 %v140_v36, %v133_v37 }
  0xed   :  { %v149_v40 = vadd.bf16 %v148_v38, %v141_v39 }
  0xef   :  { %750 = vmatmul.mubr.bf16.vlgmr.msra.gmra.mrb[0].mxu0 %v149_v40 }
  0xf0   :  { %789 = vmatprep.mubr.msk.bf16.mxu0 %vm1025_vm0, %v1020_v2  ;;  %774 = vmatpush3.bf16.msra.mxu0 %v851_v49 }
  0xf1   :  { %775 = vmatprep.subr.bf16.mxu0 %v1020_v2 }
  0xf4   :  { %776 = vmatpush3.bf16.msra.mxu0 %v852_v50 }
  0xf5   :  { %777 = vmatprep.subr.bf16.mxu0 %v1020_v2 }
  0xf8   :  { %778 = vmatpush3.bf16.msra.mxu0 %v853_v51 }
  0xf9   :  { %779 = vmatprep.subr.bf16.mxu0 %v1020_v2 }
  0xfc   :  { %780 = vmatpush3.bf16.msra.mxu0 %v854_v52 }
  0xfd   :  { %781 = vmatprep.subr.bf16.mxu0 %v1020_v2 }
 0x100   :  { %782 = vmatpush3.bf16.msra.mxu0 %v855_v53 }
 0x101   :  { %783 = vmatprep.subr.bf16.mxu0 %v1020_v2 }
 0x104   :  { %784 = vmatpush3.bf16.msra.mxu0 %v856_v54 }
 0x105   :  { %785 = vmatprep.subr.bf16.mxu0 %v1020_v2 }
 0x108   :  { %786 = vmatpush3.bf16.msra.mxu0 %v857_v4 }
 0x109   :  { %787 = vmatprep.subr.bf16.mxu0 %v1020_v2 }
 0x10c   :  { %788 = vmatpush3.bf16.msra.mxu0 %v858_v5 }
 0x1c2   :  { %v255_v56 = vpop.f32.mrb[0].mxu0 }
 0x1c3   :  { %v256_v57 = vadd.f32 %v661_v55, %v255_v56  ;;  %v751_v58 = vpop.f32.mrb[1].mxu0 }
 0x1c4   :  { %v258_v59 = vpop.f32.mrb[2].mxu0 }
 0x1c5   :  { %v261_v60 = vsub.f32 0.0, %v256_v57  ;;  %v752_v61 = vpop.f32.mrb[3].mxu0 }
 0x1c7   :  { %v262_v62 = vmul.f32 1.442695, %v261_v60 }
 0x1c9   :  { %867 = vpow2.f32 %v262_v62 }
 0x1d3   :  { %v868_v63 = vpop.eup %867 }
 0x1d4   :  { %v264_v0 = vadd.f32 1.0, %v868_v63 }
 0x1d6   :  { %869 = vrcp.f32 %v264_v0 }
 0x1e0   :  { %v870_v1 = vpop.eup %869 }
 0x1e1   :  { %v266_v3 = vpack.c.bf16 %v870_v1, %v870_v1 }
 0x1e3   :  { %770 = vmatmul.mubr.bf16.vlgmr.msra.gmra.mrb[0].mxu1 %v266_v3 }
 0x1e4   :  { %809 = vmatprep.mubr.msk.bf16.mxu1 %vm1025_vm0, %v1020_v2  ;;  %794 = vmatpush3.bf16.msra.mxu1 %v859_v6 }
 0x1e5   :  { %795 = vmatprep.subr.bf16.mxu1 %v1020_v2 }
 0x1e8   :  { %796 = vmatpush3.bf16.msra.mxu1 %v860_v7 }
 0x1e9   :  { %797 = vmatprep.subr.bf16.mxu1 %v1020_v2 }
 0x1ec   :  { %798 = vmatpush3.bf16.msra.mxu1 %v861_v8 }
 0x1ed   :  { %799 = vmatprep.subr.bf16.mxu1 %v1020_v2 }
 0x1f0   :  { %800 = vmatpush3.bf16.msra.mxu1 %v862_v9 }
 0x1f1   :  { %801 = vmatprep.subr.bf16.mxu1 %v1020_v2 }
 0x1f4   :  { %802 = vmatpush3.bf16.msra.mxu1 %v863_v10 }
 0x1f5   :  { %803 = vmatprep.subr.bf16.mxu1 %v1020_v2 }
 0x1f8   :  { %804 = vmatpush3.bf16.msra.mxu1 %v864_v11 }
 0x1f9   :  { %805 = vmatprep.subr.bf16.mxu1 %v1020_v2 }
 0x1fc   :  { %806 = vmatpush3.bf16.msra.mxu1 %v865_v20 }
 0x1fd   :  { %807 = vmatprep.subr.bf16.mxu1 %v1020_v2 }
 0x200   :  { %808 = vmatpush3.bf16.msra.mxu1 %v866_v21 }
 0x2b6   :  { %v372_v13 = vpop.f32.mrb[0].mxu1 }
 0x2b7   :  { %v373_v14 = vadd.f32 %v670_v12, %v372_v13  ;;  %v771_v15 = vpop.f32.mrb[1].mxu1 }
 0x2b8   :  { %v375_v16 = vpop.f32.mrb[2].mxu1 }
 0x2b9   :  { %v378_v17 = vmax.f32 %v373_v14, 0.0  ;;  %v772_v18 = vpop.f32.mrb[3].mxu1 }
 0x2bb   :  { %v379_v19 = vpack.c.bf16 %v378_v17, %v378_v17 }
 0x2bd   :  { %790 = vmatmul.mubr.bf16.vlgmr.msra.gmra.mrb[4].mxu0 %v379_v19 }
 0x390   :  { %v485_v23 = vpop.f32.mrb[4].mxu0 }
 0x391   :  { %v486_v24 = vadd.f32 %v679_v22, %v485_v23  ;;  %v791_v25 = vpop.f32.mrb[5].mxu0 }
 0x392   :  { %v488_v26 = vpop.f32.mrb[6].mxu0 }
 0x393   :  { %v491_v27 = vmax.f32 %v486_v24, 0.0  ;;  %v792_v28 = vpop.f32.mrb[7].mxu0 }
 0x395   :  { %v492_v29 = vpack.c.bf16 %v491_v27, %v491_v27 }
 0x397   :  { %810 = vmatmul.mubr.bf16.vlgmr.msra.gmra.mrb[4].mxu1 %v492_v29 }
 0x46a   :  { %v598_v31 = vpop.f32.mrb[4].mxu1 }
 0x46b   :  { %v599_v2 = vadd.f32 %v688_v30, %v598_v31  ;;  %v811_v32 = vpop.f32.mrb[5].mxu1 }
 0x46c   :  { %v601_v33 = vpop.f32.mrb[6].mxu1 }
 0x46d   :  { %604 = vxpose.xlu1.b32.start.end [1/1] (short) (narrow) %v599_v2, 8  ;;  %v812_v34 = vpop.f32.mrb[7].mxu1 }
 0x4ed   :  { %v620_v35 = vpop.trf.xlu1 }
 0x4ee   :  { %637 = vst.msk [vmem:[#allocation11] sm:$0x3] %vm636_vm7, %v620_v35 }
 0x4ef   :  { %992 = shalt.err (!%p989_p2)
}
 0x4f0   :  { %s993_s1 = scalar_lea.hbm %s1228_s9, 32 }
 0x4f1   :  { %p994_p3 = scmp.ne.s32.totalorder %s1228_s9, %s993_s1  ;;  %p997_p4 = scmp.lt.u32.totalorder %s993_s1, %s1228_s9 }
 0x4f3   :  { %p999_p5 = pnand %p997_p4, %p994_p3 }
 0x4f5   :  { %1002 = shalt.err (!%p999_p5)
}
 0x4f6   :  { %647 = dma.vmem_to_hbm [thread:$0]  %s645_s6, 32, %s1228_s9, [#allocation4]  }
 0x4f7   :  { %1009 = dma.done.wait [#allocation4], 32  }
 0x4f8   :  { %1010 = vsyncadd [#allocation4], 4294967264 }
 0x4f9   :  { %651 = vsyncpa [#allocation3], 1 }
 0x4fa   :  { %652 = vsyncpa [#allocation6], 1 }
 0x4fb   :  { %653 = vsyncpa [#allocation9], 1 }
 0x4fc   :  { %654 = vsyncpa [#allocation4], 1 }

// kernel: tpu_custom_call.1
= control target key start
LH: loop header
LB: loop body
LE: loop exit
PB: predicated region body
PF: predicated region fallthrough
CT: control target
= control target key end

     0   :  { %14 = vsyncpa [#allocation3], 0  ;;  %s1219_s0 = inlined_call_operand.hbm [shape: s32[8,6], index: 0, kind: input, shape index: {}]   ;;  %s1220_s1 = inlined_call_operand.hbm [shape: bf16[128,128], index: 1, kind: input, shape index: {}]   ;;  %s1221_s2 = inlined_call_operand.vmem [shape: f32[1,128], index: 2, kind: input, shape index: {}]   ;;  %s1222_s3 = inlined_call_operand.hbm [shape: bf16[128,128], index: 3, kind: input, shape index: {}]   ;;  %s1223_s4 = inlined_call_operand.vmem [shape: f32[1,128], index: 4, kind: input, shape index: {}]   ;;  %s1224_s5 = inlined_call_operand.hbm [shape: bf16[128,128], index: 5, kind: input, shape index: {}]   ;;  %s1225_s6 = inlined_call_operand.vmem [shape: f32[1,128], index: 6, kind: input, shape index: {}]   ;;  %s1226_s7 = inlined_call_operand.hbm [shape: bf16[128,128], index: 7, kind: input, shape index: {}]   ;;  %s1227_s8 = inlined_call_operand.vmem [shape: f32[1,128], index: 8, kind: input, shape index: {}]   ;;  %s1228_s9 = inlined_call_operand.hbm [shape: f32[2,8], index: 9, kind: output, shape index: {}]  }
   0x1   :  { %15 = vsyncpa [#allocation6], 0 }
   0x2   :  { %16 = vsyncpa [#allocation9], 0 }
   0x3   :  { %17 = vsyncpa [#allocation4], 0  ;;  %s1011_s30 = smov [#allocation5]   ;;  %s871_s13 = scalar_lea.hbm %s1220_s1, 1024 }
   0x4   :  { %s33_s10 = sshll.u32 %s1011_s30, 4  ;;  %p872_p0 = scmp.ne.s32.totalorder %s1220_s1, %s871_s13  ;;  %s34_s10 = int_to_ptr.vmem [resolvable:$true] %s33_s10 }
   0x5   :  { %p875_p1 = scmp.lt.u32.totalorder %s871_s13, %s1220_s1 }
   0x7   :  { %p877_p2 = pnand %p875_p1, %p872_p0 }
   0x9   :  { %880 = shalt.err (!%p877_p2)
}
   0xa   :  { %s881_s18 = scalar_lea.vmem %s34_s10, 1024  ;;  %p886_p4 = scmp.lt.s32.totalorder %s34_s10, %s34_s10 }
   0xb   :  { %p882_p3 = scmp.ne.s32.totalorder %s34_s10, %s881_s18  ;;  %p887_p5 = scmp.lt.s32.totalorder %s881_s18, %s881_s18 }
   0xd   :  { %p888_p6 = por %p887_p5, %p886_p4 }
   0xf   :  { %p889_p7 = pnand %p888_p6, %p882_p3 }
  0x11   :  { %892 = shalt.err (!%p889_p7)
}
  0x12   :  { %s1012_s19 = smov 64   ;;  %s1013_s20 = smov 4  }
  0x13   :  { %39 = dma.hbm_to_vmem [thread:$0]  %s1220_s1, 1024, %s34_s10, [#allocation6], %s1012_s19, %s1012_s19, %s1013_s20  }
  0x14   :  { %s1014_s23 = smov [#allocation8]   ;;  %s1015_s25 = smov [#allocation2]  }
  0x15   :  { %s61_s24 = sshll.u32 %s1014_s23, 4  ;;  %s24_s26 = sshll.u32 %s1015_s25, 4  ;;  %s62_s24 = int_to_ptr.vmem [resolvable:$true] %s61_s24  ;;  %s25_s26 = int_to_ptr.vmem [resolvable:$true] %s24_s26 }
  0x16   :  { %s893_s29 = scalar_lea.hbm %s1224_s5, 1024 }
  0x17   :  { %p894_p8 = scmp.ne.s32.totalorder %s1224_s5, %s893_s29  ;;  %p897_p9 = scmp.lt.u32.totalorder %s893_s29, %s1224_s5 }
  0x19   :  { %p899_p10 = pnand %p897_p9, %p894_p8 }
  0x1b   :  { %902 = shalt.err (!%p899_p10)
}
  0x1c   :  { %s903_s1 = scalar_lea.vmem %s62_s24, 1024  ;;  %p908_p12 = scmp.lt.s32.totalorder %s62_s24, %s62_s24 }
  0x1d   :  { %p904_p11 = scmp.ne.s32.totalorder %s62_s24, %s903_s1  ;;  %p909_p13 = scmp.lt.s32.totalorder %s903_s1, %s903_s1 }
  0x1f   :  { %p910_p0 = por %p909_p13, %p908_p12 }
  0x21   :  { %p911_p1 = pnand %p910_p0, %p904_p11 }
  0x23   :  { %914 = shalt.err (!%p911_p1)
}
  0x24   :  { %67 = dma.hbm_to_vmem [thread:$0]  %s1224_s5, 1024, %s62_s24, [#allocation9], %s1012_s19, %s1012_s19, %s1013_s20  }
  0x25   :  { %s915_s17 = scalar_lea.hbm %s1219_s0, 128 }
  0x26   :  { %p916_p2 = scmp.ne.s32.totalorder %s1219_s0, %s915_s17  ;;  %p919_p3 = scmp.lt.u32.totalorder %s915_s17, %s1219_s0 }
  0x28   :  { %p921_p4 = pnand %p919_p3, %p916_p2 }
  0x2a   :  { %924 = shalt.err (!%p921_p4)
}
  0x2b   :  { %s925_s25 = scalar_lea.vmem %s25_s26, 128  ;;  %p930_p6 = scmp.lt.s32.totalorder %s25_s26, %s25_s26 }
  0x2c   :  { %p926_p5 = scmp.ne.s32.totalorder %s25_s26, %s925_s25  ;;  %p931_p7 = scmp.lt.s32.totalorder %s925_s25, %s925_s25 }
  0x2e   :  { %p932_p8 = por %p931_p7, %p930_p6 }
  0x30   :  { %p933_p9 = pnand %p932_p8, %p926_p5 }
  0x32   :  { %936 = shalt.err (!%p933_p9)
}
  0x33   :  { %27 = dma.hbm_to_vmem [thread:$0]  %s1219_s0, 128, %s25_s26, [#allocation3]  }
  0x34   :  { %s1016_s27 = smov [#allocation7]   ;;  %s1017_s29 = smov [#allocation10]  }
  0x35   :  { %s47_s28 = sshll.u32 %s1016_s27, 4  ;;  %s75_s30 = sshll.u32 %s1017_s29, 4  ;;  %s48_s28 = int_to_ptr.vmem [resolvable:$true] %s47_s28  ;;  %s76_s30 = int_to_ptr.vmem [resolvable:$true] %s75_s30 }
  0x36   :  { %s937_s13 = scalar_lea.hbm %s1222_s3, 1024 }
  0x37   :  { %p938_p10 = scmp.ne.s32.totalorder %s1222_s3, %s937_s13  ;;  %p941_p11 = scmp.lt.u32.totalorder %s937_s13, %s1222_s3 }
  0x39   :  { %p943_p12 = pnand %p941_p11, %p938_p10 }
  0x3b   :  { %946 = shalt.err (!%p943_p12)
}
  0x3c   :  { %s947_s0 = scalar_lea.vmem %s48_s28, 1024  ;;  %p952_p0 = scmp.lt.s32.totalorder %s48_s28, %s48_s28 }
  0x3d   :  { %p948_p13 = scmp.ne.s32.totalorder %s48_s28, %s947_s0  ;;  %p953_p1 = scmp.lt.s32.totalorder %s947_s0, %s947_s0 }
  0x3f   :  { %p954_p2 = por %p953_p1, %p952_p0 }
  0x41   :  { %p955_p3 = pnand %p954_p2, %p948_p13 }
  0x43   :  { %958 = shalt.err (!%p955_p3)
}
  0x44   :  { %53 = dma.hbm_to_vmem [thread:$0]  %s1222_s3, 1024, %s48_s28, [#allocation6], %s1012_s19, %s1012_s19, %s1013_s20  }
  0x45   :  { %s959_s21 = scalar_lea.hbm %s1226_s7, 1024 }
  0x46   :  { %p960_p4 = scmp.ne.s32.totalorder %s1226_s7, %s959_s21  ;;  %p963_p5 = scmp.lt.u32.totalorder %s959_s21, %s1226_s7 }
  0x48   :  { %p965_p6 = pnand %p963_p5, %p960_p4 }
  0x4a   :  { %968 = shalt.err (!%p965_p6)
}
  0x4b   :  { %s969_s24 = scalar_lea.vmem %s76_s30, 1024  ;;  %p974_p8 = scmp.lt.s32.totalorder %s76_s30, %s76_s30 }
  0x4c   :  { %p970_p7 = scmp.ne.s32.totalorder %s76_s30, %s969_s24  ;;  %p975_p9 = scmp.lt.s32.totalorder %s969_s24, %s969_s24 }
  0x4e   :  { %p976_p10 = por %p975_p9, %p974_p8 }
  0x50   :  { %p977_p11 = pnand %p976_p10, %p970_p7 }
  0x52   :  { %980 = shalt.err (!%p977_p11)
}
  0x53   :  { %81 = dma.hbm_to_vmem [thread:$0]  %s1226_s7, 1024, %s76_s30, [#allocation9], %s1012_s19, %s1012_s19, %s1013_s20  }
  0x54   :  { %1003 = dma.done.wait [#allocation3], 128  }
  0x55   :  { %1004 = vsyncadd [#allocation3], 4294967168 }
  0x56   :  { %1005 = dma.done.wait [#allocation6], 2048  }
  0x57   :  { %1006 = vsyncadd [#allocation6], 4294965248 }
  0x58   :  { %1007 = dma.done.wait [#allocation9], 2048  }
  0x59   :  { %1008 = vsyncadd [#allocation9], 4294965248  ;;  %v1018_v0 = vmov 0   ;;  %v1019_v1 = vmov 2   ;;  %v1020_v2 = vmov 0.0   ;;  %v100_v3 = vld [vmem:[#allocation2] sm:$0xff]  ;;  %v101_v16 = vlaneseq }
  0x5a   :  { %829 = vset.pattern.permute.xlu0 %v1018_v0  ;;  %831 = vset.pattern.permute.xlu1 %v1019_v1  ;;  %v835_v4 = vld [vmem:[#allocation5] sm:$0xff]   ;;  %v836_v5 = vld [vmem:[#allocation5 + $0x8] sm:$0xff]   ;;  %v1021_v6 = vmov 1   ;;  %v1022_v7 = vmov 3   ;;  %v837_v8 = vld [vmem:[#allocation5 + $0x10] sm:$0xff]   ;;  %v1023_v9 = vmov 4  }
  0x5b   :  { %733 = vmatprep.subr.bf16.mxu0 %v1020_v2  ;;  %753 = vmatprep.subr.bf16.mxu1 %v1020_v2  ;;  %v1024_v10 = vmov 5   ;;  %v838_v11 = vld [vmem:[#allocation5 + $0x18] sm:$0xff]   ;;  %v839_v12 = vld [vmem:[#allocation5 + $0x20] sm:$0xff]   ;;  %vm1025_vm0 = vmmov 0   ;;  %v840_v13 = vld [vmem:[#allocation5 + $0x28] sm:$0xff]   ;;  %v102_v17 = vand.u32 127, %v101_v16 }
  0x5c   :  { %104 = vperm.xlu0 %829, %v100_v3   ;;  %119 = vperm.xlu1 %831, %v100_v3   ;;  %v841_v14 = vld [vmem:[#allocation5 + $0x30] sm:$0xff]   ;;  %v842_v15 = vld [vmem:[#allocation5 + $0x38] sm:$0xff]   ;;  %v843_v41 = vld [vmem:[#allocation7] sm:$0xff]   ;;  %s1026_s11 = smov [#allocation11]   ;;  %vm636_vm7 = vcmask 58368  }
  0x5d   :  { %734 = vmatpush3.bf16.msra.mxu0 %v835_v4  ;;  %749 = vmatprep.mubr.msk.bf16.mxu0 %vm1025_vm0, %v1020_v2  ;;  %v844_v42 = vld [vmem:[#allocation7 + $0x8] sm:$0xff]   ;;  %v845_v43 = vld [vmem:[#allocation7 + $0x10] sm:$0xff]   ;;  %v846_v44 = vld [vmem:[#allocation7 + $0x18] sm:$0xff]  }
  0x5e   :  { %735 = vmatprep.subr.bf16.mxu0 %v1020_v2  ;;  %769 = vmatprep.mubr.msk.bf16.mxu1 %vm1025_vm0, %v1020_v2  ;;  %v847_v45 = vld [vmem:[#allocation7 + $0x20] sm:$0xff]   ;;  %v848_v46 = vld [vmem:[#allocation7 + $0x28] sm:$0xff]   ;;  %v849_v47 = vld [vmem:[#allocation7 + $0x30] sm:$0xff]  }
  0x5f   :  { %754 = vmatpush3.bf16.msra.mxu1 %v843_v41  ;;  %v850_v48 = vld [vmem:[#allocation7 + $0x38] sm:$0xff]   ;;  %v851_v49 = vld [vmem:[#allocation8] sm:$0xff]   ;;  %v852_v50 = vld [vmem:[#allocation8 + $0x8] sm:$0xff]  }
  0x60   :  { %830 = vset.pattern.permute.xlu0 %v1021_v6  ;;  %832 = vset.pattern.permute.xlu1 %v1022_v7  ;;  %v853_v51 = vld [vmem:[#allocation8 + $0x10] sm:$0xff]   ;;  %v854_v52 = vld [vmem:[#allocation8 + $0x18] sm:$0xff]   ;;  %v855_v53 = vld [vmem:[#allocation8 + $0x20] sm:$0xff]  }
  0x61   :  { %111 = vperm.xlu0 %830, %v100_v3   ;;  %127 = vperm.xlu1 %832, %v100_v3   ;;  %v856_v54 = vld [vmem:[#allocation8 + $0x28] sm:$0xff]   ;;  %v661_v55 = vld [vmem:[%s1221_s2] ss:$0 sm:$0xff]  ;;  %v857_v4 = vld [vmem:[#allocation8 + $0x30] sm:$0xff]  }
  0x62   :  { %736 = vmatpush3.bf16.msra.mxu0 %v836_v5  ;;  %755 = vmatprep.subr.bf16.mxu1 %v1020_v2  ;;  %v858_v5 = vld [vmem:[#allocation8 + $0x38] sm:$0xff]   ;;  %v859_v6 = vld [vmem:[#allocation10] sm:$0xff]   ;;  %v860_v7 = vld [vmem:[#allocation10 + $0x8] sm:$0xff]  }
  0x63   :  { %737 = vmatprep.subr.bf16.mxu0 %v1020_v2  ;;  %756 = vmatpush3.bf16.msra.mxu1 %v844_v42 }
  0x64   :  { %757 = vmatprep.subr.bf16.mxu1 %v1020_v2 }
  0x65   :  { %833 = vset.pattern.permute.xlu1 %v1023_v9  ;;  %834 = vset.pattern.permute.xlu0 %v1024_v10  ;;  %v862_v9 = vld [vmem:[#allocation10 + $0x18] sm:$0xff]   ;;  %v863_v10 = vld [vmem:[#allocation10 + $0x20] sm:$0xff]  }
  0x66   :  { %135 = vperm.xlu1 %833, %v100_v3   ;;  %143 = vperm.xlu0 %834, %v100_v3  }
  0x67   :  { %738 = vmatpush3.bf16.msra.mxu0 %v837_v8  ;;  %758 = vmatpush3.bf16.msra.mxu1 %v845_v43  ;;  %v861_v8 = vld [vmem:[#allocation10 + $0x10] sm:$0xff]  }
  0x68   :  { %739 = vmatprep.subr.bf16.mxu0 %v1020_v2  ;;  %759 = vmatprep.subr.bf16.mxu1 %v1020_v2 }
  0x6b   :  { %740 = vmatpush3.bf16.msra.mxu0 %v838_v11  ;;  %760 = vmatpush3.bf16.msra.mxu1 %v846_v44  ;;  %v864_v11 = vld [vmem:[#allocation10 + $0x28] sm:$0xff]  }
  0x6c   :  { %741 = vmatprep.subr.bf16.mxu0 %v1020_v2  ;;  %761 = vmatprep.subr.bf16.mxu1 %v1020_v2 }
  0x6f   :  { %742 = vmatpush3.bf16.msra.mxu0 %v839_v12  ;;  %762 = vmatpush3.bf16.msra.mxu1 %v847_v45  ;;  %v670_v12 = vld [vmem:[%s1223_s4] ss:$0 sm:$0xff] }
  0x70   :  { %743 = vmatprep.subr.bf16.mxu0 %v1020_v2  ;;  %763 = vmatprep.subr.bf16.mxu1 %v1020_v2 }
  0x73   :  { %744 = vmatpush3.bf16.msra.mxu0 %v840_v13  ;;  %764 = vmatpush3.bf16.msra.mxu1 %v848_v46 }
  0x74   :  { %745 = vmatprep.subr.bf16.mxu0 %v1020_v2  ;;  %765 = vmatprep.subr.bf16.mxu1 %v1020_v2 }
  0x77   :  { %746 = vmatpush3.bf16.msra.mxu0 %v841_v14  ;;  %766 = vmatpush3.bf16.msra.mxu1 %v849_v47 }
  0x78   :  { %747 = vmatprep.subr.bf16.mxu0 %v1020_v2  ;;  %767 = vmatprep.subr.bf16.mxu1 %v1020_v2 }
  0x7b   :  { %748 = vmatpush3.bf16.msra.mxu0 %v842_v15  ;;  %768 = vmatpush3.bf16.msra.mxu1 %v850_v48 }
  0x7c   :  { %773 = vmatprep.subr.bf16.mxu0 %v1020_v2  ;;  %793 = vmatprep.subr.bf16.mxu1 %v1020_v2 }
  0xdb   :  { %v105_v18 = vpop.permute.xlu0 %104  ;;  %v120_v19 = vpop.permute.xlu1 %119 }
  0xdc   :  { %vm106_vm1 = vcmp.eq.s32.totalorder %v102_v17, %v105_v18  ;;  %vm121_vm2 = vcmp.eq.s32.totalorder %v102_v17, %v120_v19 }
  0xdd   :  { %v655_v20 = vsel %vm106_vm1, 1.0, %v1020_v2  ;;  %v657_v23 = vsel %vm121_vm2, 1.0, %v1020_v2 }
  0xde   :  { %v109_v25 = vpack.c.bf16 %v655_v20, %v655_v20  ;;  %v124_v28 = vpack.c.bf16 %v657_v23, %v657_v23  ;;  %v865_v20 = vld [vmem:[#allocation10 + $0x30] sm:$0xff]  }
  0xe0   :  { %v112_v21 = vpop.permute.xlu0 %111  ;;  %v128_v22 = vpop.permute.xlu1 %127 }
  0xe1   :  { %vm113_vm3 = vcmp.eq.s32.totalorder %v102_v17, %v112_v21  ;;  %vm129_vm4 = vcmp.eq.s32.totalorder %v102_v17, %v128_v22  ;;  %v866_v21 = vld [vmem:[#allocation10 + $0x38] sm:$0xff]  }
  0xe2   :  { %v656_v24 = vsel %vm113_vm3, 1.0, %v1020_v2  ;;  %v658_v27 = vsel %vm129_vm4, 1.0, %v1020_v2  ;;  %v679_v22 = vld [vmem:[%s1225_s6] ss:$0 sm:$0xff]  ;;  %s644_s6 = sshll.u32 %s1026_s11, 4  ;;  %s645_s6 = int_to_ptr.vmem [resolvable:$true] %s644_s6 }
  0xe3   :  { %v116_v26 = vpack.c.bf16 %v656_v24, %v656_v24  ;;  %v132_v33 = vpack.c.bf16 %v658_v27, %v658_v27  ;;  %s981_s12 = scalar_lea.vmem %s645_s6, 32  ;;  %p986_p13 = scmp.lt.s32.totalorder %s645_s6, %s645_s6 }
  0xe4   :  { %p982_p12 = scmp.ne.s32.totalorder %s645_s6, %s981_s12  ;;  %p987_p0 = scmp.lt.s32.totalorder %s981_s12, %s981_s12 }
  0xe5   :  { %v117_v29 = vadd.bf16 %v116_v26, %v109_v25  ;;  %v136_v30 = vpop.permute.xlu1 %135  ;;  %v144_v31 = vpop.permute.xlu0 %143 }
  0xe6   :  { %vm137_vm5 = vcmp.eq.s32.totalorder %v102_v17, %v136_v30  ;;  %vm145_vm6 = vcmp.eq.s32.totalorder %v102_v17, %v144_v31  ;;  %v688_v30 = vld [vmem:[%s1227_s8] ss:$0 sm:$0xff]  ;;  %p988_p1 = por %p987_p0, %p986_p13 }
  0xe7   :  { %v125_v32 = vadd.bf16 %v124_v28, %v117_v29  ;;  %v659_v34 = vsel %vm137_vm5, 1.0, %v1020_v2  ;;  %v660_v35 = vsel %vm145_vm6, 1.0, %v1020_v2 }
  0xe8   :  { %v140_v36 = vpack.c.bf16 %v659_v34, %v659_v34  ;;  %v148_v38 = vpack.c.bf16 %v660_v35, %v660_v35  ;;  %p989_p2 = pnand %p988_p1, %p982_p12 }
  0xe9   :  { %v133_v37 = vadd.bf16 %v132_v33, %v125_v32 }
  0xeb   :  { %v141_v39 = vadd.bf16 %v140_v36, %v133_v37 }
  0xed   :  { %v149_v40 = vadd.bf16 %v148_v38, %v141_v39 }
  0xef   :  { %750 = vmatmul.mubr.bf16.vlgmr.msra.gmra.mrb[0].mxu0 %v149_v40 }
  0xf0   :  { %789 = vmatprep.mubr.msk.bf16.mxu0 %vm1025_vm0, %v1020_v2  ;;  %774 = vmatpush3.bf16.msra.mxu0 %v851_v49 }
  0xf1   :  { %775 = vmatprep.subr.bf16.mxu0 %v1020_v2 }
  0xf4   :  { %776 = vmatpush3.bf16.msra.mxu0 %v852_v50 }
  0xf5   :  { %777 = vmatprep.subr.bf16.mxu0 %v1020_v2 }
  0xf8   :  { %778 = vmatpush3.bf16.msra.mxu0 %v853_v51 }
  0xf9   :  { %779 = vmatprep.subr.bf16.mxu0 %v1020_v2 }
  0xfc   :  { %780 = vmatpush3.bf16.msra.mxu0 %v854_v52 }
  0xfd   :  { %781 = vmatprep.subr.bf16.mxu0 %v1020_v2 }
 0x100   :  { %782 = vmatpush3.bf16.msra.mxu0 %v855_v53 }
 0x101   :  { %783 = vmatprep.subr.bf16.mxu0 %v1020_v2 }
 0x104   :  { %784 = vmatpush3.bf16.msra.mxu0 %v856_v54 }
 0x105   :  { %785 = vmatprep.subr.bf16.mxu0 %v1020_v2 }
 0x108   :  { %786 = vmatpush3.bf16.msra.mxu0 %v857_v4 }
 0x109   :  { %787 = vmatprep.subr.bf16.mxu0 %v1020_v2 }
 0x10c   :  { %788 = vmatpush3.bf16.msra.mxu0 %v858_v5 }
 0x1c2   :  { %v255_v56 = vpop.f32.mrb[0].mxu0 }
 0x1c3   :  { %v256_v57 = vadd.f32 %v661_v55, %v255_v56  ;;  %v751_v58 = vpop.f32.mrb[1].mxu0 }
 0x1c4   :  { %v258_v59 = vpop.f32.mrb[2].mxu0 }
 0x1c5   :  { %v261_v60 = vsub.f32 0.0, %v256_v57  ;;  %v752_v61 = vpop.f32.mrb[3].mxu0 }
 0x1c7   :  { %v262_v62 = vmul.f32 1.442695, %v261_v60 }
 0x1c9   :  { %867 = vpow2.f32 %v262_v62 }
 0x1d3   :  { %v868_v63 = vpop.eup %867 }
 0x1d4   :  { %v264_v0 = vadd.f32 1.0, %v868_v63 }
 0x1d6   :  { %869 = vrcp.f32 %v264_v0 }
 0x1e0   :  { %v870_v1 = vpop.eup %869 }
 0x1e1   :  { %v266_v3 = vpack.c.bf16 %v870_v1, %v870_v1 }
 0x1e3   :  { %770 = vmatmul.mubr.bf16.vlgmr.msra.gmra.mrb[0].mxu1 %v266_v3 }
 0x1e4   :  { %809 = vmatprep.mubr.msk.bf16.mxu1 %vm1025_vm0, %v1020_v2  ;;  %794 = vmatpush3.bf16.msra.mxu1 %v859_v6 }
 0x1e5   :  { %795 = vmatprep.subr.bf16.mxu1 %v1020_v2 }
 0x1e8   :  { %796 = vmatpush3.bf16.msra.mxu1 %v860_v7 }
 0x1e9   :  { %797 = vmatprep.subr.bf16.mxu1 %v1020_v2 }
 0x1ec   :  { %798 = vmatpush3.bf16.msra.mxu1 %v861_v8 }
 0x1ed   :  { %799 = vmatprep.subr.bf16.mxu1 %v1020_v2 }
 0x1f0   :  { %800 = vmatpush3.bf16.msra.mxu1 %v862_v9 }
 0x1f1   :  { %801 = vmatprep.subr.bf16.mxu1 %v1020_v2 }
 0x1f4   :  { %802 = vmatpush3.bf16.msra.mxu1 %v863_v10 }
 0x1f5   :  { %803 = vmatprep.subr.bf16.mxu1 %v1020_v2 }
 0x1f8   :  { %804 = vmatpush3.bf16.msra.mxu1 %v864_v11 }
 0x1f9   :  { %805 = vmatprep.subr.bf16.mxu1 %v1020_v2 }
 0x1fc   :  { %806 = vmatpush3.bf16.msra.mxu1 %v865_v20 }
 0x1fd   :  { %807 = vmatprep.subr.bf16.mxu1 %v1020_v2 }
 0x200   :  { %808 = vmatpush3.bf16.msra.mxu1 %v866_v21 }
 0x2b6   :  { %v372_v13 = vpop.f32.mrb[0].mxu1 }
 0x2b7   :  { %v373_v14 = vadd.f32 %v670_v12, %v372_v13  ;;  %v771_v15 = vpop.f32.mrb[1].mxu1 }
 0x2b8   :  { %v375_v16 = vpop.f32.mrb[2].mxu1 }
 0x2b9   :  { %v378_v17 = vmax.f32 %v373_v14, 0.0  ;;  %v772_v18 = vpop.f32.mrb[3].mxu1 }
 0x2bb   :  { %v379_v19 = vpack.c.bf16 %v378_v17, %v378_v17 }
 0x2bd   :  { %790 = vmatmul.mubr.bf16.vlgmr.msra.gmra.mrb[4].mxu0 %v379_v19 }
 0x390   :  { %v485_v23 = vpop.f32.mrb[4].mxu0 }
 0x391   :  { %v486_v24 = vadd.f32 %v679_v22, %v485_v23  ;;  %v791_v25 = vpop.f32.mrb[5].mxu0 }
 0x392   :  { %v488_v26 = vpop.f32.mrb[6].mxu0 }
 0x393   :  { %v491_v27 = vmax.f32 %v486_v24, 0.0  ;;  %v792_v28 = vpop.f32.mrb[7].mxu0 }
 0x395   :  { %v492_v29 = vpack.c.bf16 %v491_v27, %v491_v27 }
 0x397   :  { %810 = vmatmul.mubr.bf16.vlgmr.msra.gmra.mrb[4].mxu1 %v492_v29 }
 0x46a   :  { %v598_v31 = vpop.f32.mrb[4].mxu1 }
 0x46b   :  { %v599_v2 = vadd.f32 %v688_v30, %v598_v31  ;;  %v811_v32 = vpop.f32.mrb[5].mxu1 }
 0x46c   :  { %v601_v33 = vpop.f32.mrb[6].mxu1 }
 0x46d   :  { %604 = vxpose.xlu1.b32.start.end [1/1] (short) (narrow) %v599_v2, 8  ;;  %v812_v34 = vpop.f32.mrb[7].mxu1 }
 0x4ed   :  { %v620_v35 = vpop.trf.xlu1 }
 0x4ee   :  { %637 = vst.msk [vmem:[#allocation11] sm:$0x3] %vm636_vm7, %v620_v35 }
 0x4ef   :  { %992 = shalt.err (!%p989_p2)
}
 0x4f0   :  { %s993_s1 = scalar_lea.hbm %s1228_s9, 32 }
 0x4f1   :  { %p994_p3 = scmp.ne.s32.totalorder %s1228_s9, %s993_s1  ;;  %p997_p4 = scmp.lt.u32.totalorder %s993_s1, %s1228_s9 }
 0x4f3   :  { %p999_p5 = pnand %p997_p4, %p994_p3 }
 0x4f5   :  { %1002 = shalt.err (!%p999_p5)
}
 0x4f6   :  { %647 = dma.vmem_to_hbm [thread:$0]  %s645_s6, 32, %s1228_s9, [#allocation4]  }
 0x4f7   :  { %1009 = dma.done.wait [#allocation4], 32  }
 0x4f8   :  { %1010 = vsyncadd [#allocation4], 4294967264 }
 0x4f9   :  { %651 = vsyncpa [#allocation3], 1 }
 0x4fa   :  { %652 = vsyncpa [#allocation6], 1 }
 0x4fb   :  { %653 = vsyncpa [#allocation9], 1 }
 0x4fc   :  { %654 = vsyncpa [#allocation4], 1 }

</bundles_post_ra>
